<compile_context>
chip_gen: v5e
topology: v5e:2x2
jax: 0.10.0
libtpu: 0.0.40
codegen_flags: <defaults>
</compile_context>

<pallas_src>
import functools

import jax
import jax.numpy as jnp
from jax import lax
from jax.experimental import pallas as pl
from jax.experimental.pallas import tpu as pltpu


# ----------------------------------------------------------------------------
# VGG19 structure (matches NAMES['vgg19'] in the PyTorch reference)
# ----------------------------------------------------------------------------
NAMES_VGG19 = [
    'conv1_1', 'relu1_1', 'conv1_2', 'relu1_2', 'pool1',
    'conv2_1', 'relu2_1', 'conv2_2', 'relu2_2', 'pool2',
    'conv3_1', 'relu3_1', 'conv3_2', 'relu3_2', 'conv3_3', 'relu3_3',
    'conv3_4', 'relu3_4', 'pool3',
    'conv4_1', 'relu4_1', 'conv4_2', 'relu4_2', 'conv4_3', 'relu4_3',
    'conv4_4', 'relu4_4', 'pool4',
    'conv5_1', 'relu5_1', 'conv5_2', 'relu5_2', 'conv5_3', 'relu5_3',
    'conv5_4', 'relu5_4', 'pool5',
]

_VGG19_CONV_OUT = {}
for _blk, (_n, _ch) in {1: (2, 64), 2: (2, 128), 3: (4, 256),
                        4: (4, 512), 5: (4, 512)}.items():
    for _i in range(1, _n + 1):
        _VGG19_CONV_OUT[f'conv{_blk}_{_i}'] = _ch


# ----------------------------------------------------------------------------
# Generation-aware budgets and tiling helpers
# ----------------------------------------------------------------------------
def _tpu_budgets():
    """(vmem_limit_bytes, per-stage budget, gram thw tile target), per chip generation."""
    cap = None
    try:
        info = pltpu.get_tpu_info()
        cap = getattr(info, 'vmem_capacity_bytes', None)
    except Exception:
        cap = None
    if not cap:
        cap = 64 * 1024 * 1024                       # conservative default (v7x per-TC)
    if cap >= 100 * 1024 * 1024:                     # v5e / v6e: 128 MiB physical VMEM
        return 96 * 1024 * 1024, 48 * 1024 * 1024, 8192
    return 48 * 1024 * 1024, 24 * 1024 * 1024, 4096  # v7x: 64 MiB per TensorCore


_VMEM_LIMIT, _STAGE_BUDGET, _THW_TARGET = _tpu_budgets()


def _cparams(*semantics):
    return pltpu.CompilerParams(dimension_semantics=tuple(semantics),
                                vmem_limit_bytes=_VMEM_LIMIT)


def _largest_divisor(n, target, multiple_of=1):
    """Largest divisor of n that is <= target (preferring multiples of `multiple_of`)."""
    t = max(1, min(n, target))
    for d in range(t, 0, -1):
        if n % d == 0 and d % multiple_of == 0:
            return d
    for d in range(t, 0, -1):
        if n % d == 0:
            return d
    return n


def _row_chunk(W, tcout, R):
    """Largest divisor of R whose f32 accumulator chunk stays roughly vreg-resident."""
    limit = 256 * 1024
    rc = 1
    for d in range(1, R + 1):
        if R % d == 0 and d * W * tcout * 4 <= limit:
            rc = d
    return rc


def _pick_conv_rows(H, W, cin, tcout, n_out):
    """Largest row band R dividing H whose pipeline-stage footprint fits the budget."""
    # TODO(synk): ragged last band (H % R != 0) degrades to R=1; masked partial bands
    # would remove this divisibility cliff.
    best = 1
    for r in range(1, min(H, 256) + 1):
        if H % r:
            continue
        rc = _row_chunk(W, tcout, r)
        if r // rc > 8:                               # bound kernel unrolling
            continue
        in_b = (r + 2) * (W + 2) * cin * 2            # bf16 input band (with halo)
        out_b = n_out * r * W * tcout * 2             # bf16 output band(s)
        w_b = 9 * cin * tcout * 2                     # bf16 weights
        acc_b = 2 * rc * W * tcout * 4                # live f32 accumulator (+headroom)
        total = 2 * (in_b + out_b + w_b) + acc_b
        if total <= _STAGE_BUDGET:
            best = r
    return best


def _pick_pool_rows(H, W, C):
    best = 2 if H >= 2 else 1
    for r in range(2, min(H, 512) + 1, 2):
        if H % r:
            continue
        total = 2 * (r * W * C * 2 + (r // 2) * (W // 2) * C * 2)
        if total <= _STAGE_BUDGET:
            best = r
    return best


# ----------------------------------------------------------------------------
# Pallas kernels
# ----------------------------------------------------------------------------
def _conv3x3_kernel(x_ref, w_ref, b_ref, *o_refs, apply_relu, also_preact, row_chunk):
    """3x3 conv (pad=1, stride=1) on one (row-band, Cout-tile) block.

    x_ref: (1, R+2, W+2, Cin) bf16 (halo rows/cols included)
    w_ref: (9, Cin, Cout_tile) bf16      (one tap per leading index, K = Cin on the MXU)
    b_ref: (1, Cout_tile) f32
    o_refs: [(1, R, W, Cout_tile) bf16 pre-activation (optional)], (1,R,W,Ct) bf16 post
    """
    post_ref = o_refs[-1]
    _, R, W, Co = post_ref.shape
    Cin = x_ref.shape[-1]
    x = x_ref[0]                                           # (R+2, W+2, Cin)
    bias = b_ref[...]                                      # (1, Co) f32

    # TODO(synk): conv1_1 (Cin=3) could fold kh,kw into one K=27 dot and block-1 layouts
    # could fold a factor of W into the lane dim to avoid Cout=64 partial vregs.
    for r0 in range(0, R, row_chunk):
        acc = None
        for kh in range(3):
            for kw in range(3):
                tap = x[r0 + kh:r0 + kh + row_chunk, kw:kw + W, :].reshape(
                    row_chunk * W, Cin)
                contrib = jnp.dot(tap, w_ref[kh * 3 + kw],
                                  preferred_element_type=jnp.float32)
                acc = contrib if acc is None else acc + contrib
        acc = acc + bias
        if also_preact:
            o_refs[0][0, r0:r0 + row_chunk] = acc.reshape(
                row_chunk, W, Co).astype(o_refs[0].dtype)
        if apply_relu:
            acc = jnp.maximum(acc, 0.0)                    # fused ReLU epilogue (VPU)
        post_ref[0, r0:r0 + row_chunk] = acc.reshape(
            row_chunk, W, Co).astype(post_ref.dtype)


def _relu_kernel(x_ref, o_ref):
    o_ref[...] = jnp.maximum(x_ref[...], 0)


def _maxpool2x2_kernel(x_ref, o_ref):
    """2x2 max pool, stride 2.  x_ref: (1, R, W, C); o_ref: (1, R//2, W//2, C)."""
    x = x_ref[0]                                           # (R, W, C) value
    a = jnp.maximum(x[:, 0::2, :], x[:, 1::2, :])          # pair columns (sublane axis)
    o_ref[0] = jnp.maximum(a[0::2], a[1::2])               # pair rows


def _gram_kernel(f_ref, o_ref, *, scale):
    """Gram matrix with HW as a reduction grid axis.  f_ref: (1, thw, C); o_ref: (1,C,C)."""
    k = pl.program_id(1)

    @pl.when(k == 0)
    def _():
        o_ref[...] = jnp.zeros_like(o_ref)

    f = f_ref[0]                                           # (thw, C) bf16
    o_ref[0] += lax.dot_general(f, f, (((0,), (0,)), ((), ())),
                                preferred_element_type=jnp.float32)

    @pl.when(k == pl.num_programs(1) - 1)
    def _():
        o_ref[...] = o_ref[...] * scale


def _diff_reduce_kernel(a_ref, b_ref, o_ref, *, mode):
    """Accumulate sum |a-b| (mode='l1') or sum (a-b)^2 (mode='sq') per parallel slice."""
    @pl.when(pl.program_id(1) == 0)
    def _():
        o_ref[...] = jnp.zeros_like(o_ref)

    d = a_ref[...].astype(jnp.float32) - b_ref[...].astype(jnp.float32)
    v = jnp.abs(d) if mode == 'l1' else d * d
    o_ref[...] += jnp.sum(v)


# ----------------------------------------------------------------------------
# Pallas-call wrappers
# ----------------------------------------------------------------------------
def conv3x3_pallas(x_nhwc, w9, b, *, apply_relu, also_preact=False):
    """x_nhwc: (N,H,W,Cin); w9: (9, Cin, Cout) bf16; b: (1, Cout) f32.

    Returns post-activation output, or (pre_activation, post_activation) if also_preact.
    """
    N, H, W, Cin = x_nhwc.shape
    Cout = w9.shape[2]
    tcout = Cout                       # keep the whole Cout resident (<=512 for VGG19)
    n_cout = Cout // tcout
    n_out = 2 if also_preact else 1
    R = _pick_conv_rows(H, W, Cin, tcout, n_out)
    rc = _row_chunk(W, tcout, R)
    n_band = H // R

    x_nhwc = x_nhwc.astype(jnp.bfloat16)
    xp = jnp.pad(x_nhwc, ((0, 0), (1, 1), (1, 1), (0, 0)))          # (N, H+2, W+2, Cin)
    if n_band == 1:
        xb = xp                                                     # no extra copy
    else:
        # TODO(synk): overlapping halo bands are still materialized with jnp.take; a
        # manual-DMA (pl.ANY) halo fetch would remove this extra HBM round trip.
        idx = (jnp.arange(n_band) * R)[:, None] + jnp.arange(R + 2)[None, :]
        xb = jnp.take(xp, idx, axis=1).reshape(N * n_band, R + 2, W + 2, Cin)

    out_sds = jax.ShapeDtypeStruct((N * n_band, R, W, Cout), jnp.bfloat16)
    if also_preact:
        out_shape = (out_sds, out_sds)
        out_specs = [pl.BlockSpec((1, R, W, tcout), lambda co, g: (g, 0, 0, co)),
                     pl.BlockSpec((1, R, W, tcout), lambda co, g: (g, 0, 0, co))]
    else:
        out_shape = out_sds
        out_specs = pl.BlockSpec((1, R, W, tcout), lambda co, g: (g, 0, 0, co))

    # Grid order (cout_tile, band): the weight tile index only changes on the OUTER axis,
    # so weights stay VMEM-resident across all row bands (no per-band weight re-DMA).
    outs = pl.pallas_call(
        functools.partial(_conv3x3_kernel, apply_relu=apply_relu,
                          also_preact=also_preact, row_chunk=rc),
        out_shape=out_shape,
        grid=(n_cout, N * n_band),
        in_specs=[
            pl.BlockSpec((1, R + 2, W + 2, Cin), lambda co, g: (g, 0, 0, 0)),
            pl.BlockSpec((9, Cin, tcout), lambda co, g: (0, 0, co)),
            pl.BlockSpec((1, tcout), lambda co, g: (0, co)),
        ],
        out_specs=out_specs,
        compiler_params=_cparams("parallel", "parallel"),
    )(xb, w9, b)

    if also_preact:
        pre, post = outs
        return pre.reshape(N, H, W, Cout), post.reshape(N, H, W, Cout)
    return outs.reshape(N, H, W, Cout)


def relu_pallas(x):
    # Only used if a ReLU layer is not immediately preceded by a conv (never for vgg19;
    # ReLU is otherwise fused into the conv epilogue).
    shape = x.shape
    C = shape[-1]
    x2 = x.reshape(-1, C)
    Rt = x2.shape[0]
    tr = _largest_divisor(Rt, 4096, 8)
    out = pl.pallas_call(
        _relu_kernel,
        out_shape=jax.ShapeDtypeStruct((Rt, C), x.dtype),
        grid=(Rt // tr,),
        in_specs=[pl.BlockSpec((tr, C), lambda i: (i, 0))],
        out_specs=pl.BlockSpec((tr, C), lambda i: (i, 0)),
        compiler_params=_cparams("parallel"),
    )(x2)
    return out.reshape(shape)


def maxpool2x2_pallas(x):
    N, H, W, C = x.shape
    He, We = (H // 2) * 2, (W // 2) * 2          # PyTorch MaxPool2d floors odd dims
    if (He, We) != (H, W):
        x = x[:, :He, :We, :]
    Ho, Wo = He // 2, We // 2
    R = _pick_pool_rows(He, We, C)
    n_band = He // R
    return pl.pallas_call(
        _maxpool2x2_kernel,
        out_shape=jax.ShapeDtypeStruct((N, Ho, Wo, C), x.dtype),
        grid=(N, n_band),
        in_specs=[pl.BlockSpec((1, R, We, C), lambda n, b: (n, b, 0, 0))],
        out_specs=pl.BlockSpec((1, R // 2, Wo, C), lambda n, b: (n, b, 0, 0)),
        compiler_params=_cparams("parallel", "parallel"),
    )(x)


def gram_pallas(feat_nhwc):
    N, H, W, C = feat_nhwc.shape
    HW = H * W
    f = feat_nhwc.reshape(N, HW, C)
    thw = _largest_divisor(HW, _THW_TARGET, 8)
    scale = 1.0 / float(C * H * W)
    return pl.pallas_call(
        functools.partial(_gram_kernel, scale=scale),
        out_shape=jax.ShapeDtypeStruct((N, C, C), jnp.float32),
        grid=(N, HW // thw),
        in_specs=[pl.BlockSpec((1, thw, C), lambda n, k: (n, k, 0))],
        out_specs=pl.BlockSpec((1, C, C), lambda n, k: (n, 0, 0)),
        compiler_params=_cparams("parallel", "arbitrary"),
    )(f)


def diff_reduce_pallas(a, b, mode):
    C = a.shape[-1]
    a2 = a.reshape(-1, C)
    b2 = b.reshape(-1, C)
    Rt = a2.shape[0]
    tr = _largest_divisor(Rt, 4096, 8)
    n_steps = Rt // tr
    # Two partial accumulators on a leading "parallel" axis (v7x 2-TC occupancy).
    n_par = 2 if (n_steps >= 2 and n_steps % 2 == 0) else 1
    steps = n_steps // n_par
    out = pl.pallas_call(
        functools.partial(_diff_reduce_kernel, mode=mode),
        out_shape=jax.ShapeDtypeStruct((n_par, 1, 1), jnp.float32),
        grid=(n_par, steps),
        in_specs=[pl.BlockSpec((tr, C), lambda p, k: (p * steps + k, 0)),
                  pl.BlockSpec((tr, C), lambda p, k: (p * steps + k, 0))],
        out_specs=pl.BlockSpec((1, 1, 1), lambda p, k: (p, 0, 0)),
        compiler_params=_cparams("parallel", "arbitrary"),
    )(a2, b2)
    return jnp.sum(out)


# ----------------------------------------------------------------------------
# PerceptualLoss (forward-pass semantics of the PyTorch module)
# ----------------------------------------------------------------------------
class PerceptualLossPallas:
    def __init__(self, layer_weights, vgg_type='vgg19', use_input_norm=True,
                 range_norm=False, perceptual_weight=1.0, style_weight=0.0,
                 criterion='l1', seed=42):
        assert vgg_type == 'vgg19', "only plain vgg19 is implemented here"
        if criterion not in ('l1', 'l2', 'fro'):
            raise NotImplementedError(f'{criterion} criterion has not been supported.')
        self.layer_weights = dict(layer_weights)
        self.use_input_norm = use_input_norm
        self.range_norm = range_norm
        self.perceptual_weight = perceptual_weight
        self.style_weight = style_weight
        self.criterion_type = criterion

        max_idx = max(NAMES_VGG19.index(k) for k in self.layer_weights)
        self.names = NAMES_VGG19[:max_idx + 1]

        # Deterministic synthetic VGG19 parameters (He-normal), stored MXU-ready as
        # (9, Cin, Cout) bf16 per-tap weights with f32 bias.
        # TODO(synk): no clean equivalent of loading the pretrained vgg19 .pth checkpoint.
        key = jax.random.PRNGKey(seed)
        self.params = {}
        in_ch = 3
        for name in self.names:
            if name.startswith('conv'):
                out_ch = _VGG19_CONV_OUT[name]
                key, k_w, k_b = jax.random.split(key, 3)
                std = (2.0 / (9.0 * in_ch)) ** 0.5
                w = jax.random.normal(k_w, (3, 3, in_ch, out_ch), jnp.float32) * std
                b = jax.random.normal(k_b, (1, out_ch), jnp.float32) * 0.01
                w9 = w.reshape(9, in_ch, out_ch).astype(jnp.bfloat16)
                self.params[name] = (w9, b)
                in_ch = out_ch

        self._mean = jnp.asarray([0.485, 0.456, 0.406], jnp.float32)
        self._std = jnp.asarray([0.229, 0.224, 0.225], jnp.float32)

    # --- VGG feature extraction (NCHW in, features kept internally as NHWC bf16) ---
    def _features(self, x_nchw):
        x = jnp.transpose(x_nchw.astype(jnp.float32), (0, 2, 3, 1))     # -> NHWC
        if self.range_norm:
            x = (x + 1.0) / 2.0
        if self.use_input_norm:
            x = (x - self._mean) / self._std
        x = x.astype(jnp.bfloat16)

        layer_set = set(self.layer_weights.keys())
        feats = {}
        names = self.names
        i = 0
        while i < len(names):
            name = names[i]
            if name.startswith('conv'):
                w9, b = self.params[name]
                nxt = names[i + 1] if i + 1 < len(names) else None
                has_relu = nxt is not None and nxt.startswith('relu')
                if has_relu:
                    if name in layer_set:
                        # Emit pre-activation feature and ReLU'd tensor from one call.
                        pre, x = conv3x3_pallas(x, w9, b, apply_relu=True,
                                                also_preact=True)
                        feats[name] = pre
                    else:
                        x = conv3x3_pallas(x, w9, b, apply_relu=True)
                    if nxt in layer_set:
                        feats[nxt] = x
                    i += 2
                else:
                    x = conv3x3_pallas(x, w9, b, apply_relu=False)
                    if name in layer_set:
                        feats[name] = x
                    i += 1
                continue
            if name.startswith('relu'):
                x = relu_pallas(x)          # unreachable for vgg19 (relu always fused)
            elif name.startswith('pool'):
                x = maxpool2x2_pallas(x)
            if name in layer_set:
                feats[name] = x
            i += 1
        return feats

    def _elem_loss(self, a, b):
        if self.criterion_type == 'l1':
            return diff_reduce_pallas(a, b, 'l1') / float(a.size)
        if self.criterion_type == 'l2':
            return diff_reduce_pallas(a, b, 'sq') / float(a.size)
        return jnp.sqrt(diff_reduce_pallas(a, b, 'sq'))     # 'fro'

    def __call__(self, x, gt):
        """x, gt: NCHW float32 tensors.  Returns (percep_loss, style_loss)."""
        # TODO(synk): forward-only; no custom VJP is defined for the Pallas kernels.
        N = x.shape[0]
        # One batched VGG pass over [x ; stop_grad(gt)]: halves weight HBM reads and
        # pallas_call launches, and doubles the leading parallel grid axis.
        feats = self._features(jnp.concatenate(
            [x, jax.lax.stop_gradient(gt)], axis=0))

        if self.perceptual_weight > 0:
            percep_loss = jnp.float32(0.0)
            for k in feats.keys():
                fx, fg = feats[k][:N], feats[k][N:]
                percep_loss = percep_loss + self._elem_loss(fx, fg) * self.layer_weights[k]
            percep_loss = percep_loss * self.perceptual_weight
        else:
            percep_loss = None

        if self.style_weight > 0:
            style_loss = jnp.float32(0.0)
            for k in feats.keys():
                g = gram_pallas(feats[k])                   # batched gram over 2N
                style_loss = style_loss + self._elem_loss(g[:N], g[N:]) * self.layer_weights[k]
            style_loss = style_loss * self.style_weight
        else:
            style_loss = None

        return percep_loss, style_loss


# ----------------------------------------------------------------------------
if __name__ == "__main__":
    key = jax.random.PRNGKey(0)
    kx, kg = jax.random.split(key)
    # Inputs in [0, 1], NCHW, 3 channels (RGB) as required by VGG.
    x = jax.random.uniform(kx, (2, 3, 16, 16), jnp.float32)
    gt = jax.random.uniform(kg, (2, 3, 16, 16), jnp.float32)

    loss_mod = PerceptualLossPallas(
        layer_weights={'relu1_1': 0.1, 'conv2_2': 0.25, 'relu3_1': 1.0},
        vgg_type='vgg19',
        use_input_norm=True,
        range_norm=False,
        perceptual_weight=1.0,
        style_weight=0.1,
        criterion='l1',
    )

    percep_loss, style_loss = loss_mod(x, gt)
    jax.block_until_ready(percep_loss)
    jax.block_until_ready(style_loss)
    assert jnp.isfinite(percep_loss) and jnp.isfinite(style_loss)
    print("KERNEL_OK")
</pallas_src>

<mosaic_0001>
module attributes {stable_mosaic.version = 11 : i64} {
  func.func @_conv3x3_kernel(%arg0: i32, %arg1: i32, %arg2: memref<1x18x18x3xbf16, #tpu.memory_space<vmem>>, %arg3: memref<9x3x64xbf16, #tpu.memory_space<vmem>>, %arg4: memref<1x64xf32, #tpu.memory_space<vmem>>, %arg5: memref<1x16x16x64xbf16, #tpu.memory_space<vmem>>) attributes {dimension_semantics = [#tpu.dimension_semantics<parallel>, #tpu.dimension_semantics<parallel>], iteration_bounds = array<i64: 1, 4>, scalar_prefetch = 0 : i64, scratch_operands = 0 : i64, tpu.core_type = #tpu.core_type<tc>, window_params = [{transform_indices = @transform_0, window_bounds = array<i64: 1, 18, 18, 3>}, {transform_indices = @transform_1, window_bounds = array<i64: 9, 3, 64>}, {transform_indices = @transform_2, window_bounds = array<i64: 1, 64>}, {transform_indices = @transform_3, window_bounds = array<i64: 1, 16, 16, 64>}]} {
    %c0 = arith.constant 0 : index
    %c0_0 = arith.constant 0 : index
    %c0_1 = arith.constant 0 : index
    %c0_2 = arith.constant 0 : index
    %0 = vector.load %arg2[%c0, %c0_0, %c0_1, %c0_2] : memref<1x18x18x3xbf16, #tpu.memory_space<vmem>>, vector<1x18x18x3xbf16>
    %1 = vector.shape_cast %0 : vector<1x18x18x3xbf16> to vector<18x18x3xbf16>
    %c0_3 = arith.constant 0 : index
    %c0_4 = arith.constant 0 : index
    %2 = vector.load %arg4[%c0_3, %c0_4] : memref<1x64xf32, #tpu.memory_space<vmem>>, vector<1x64xf32>
    %3 = vector.extract_strided_slice %1 {offsets = [0, 0, 0], sizes = [16, 16, 3], strides = [1, 1, 1]} : vector<18x18x3xbf16> to vector<16x16x3xbf16>
    %4 = vector.shape_cast %3 : vector<16x16x3xbf16> to vector<256x3xbf16>
    %c0_5 = arith.constant 0 : index
    %c0_6 = arith.constant 0 : index
    %c0_7 = arith.constant 0 : index
    %5 = vector.load %arg3[%c0_5, %c0_6, %c0_7] : memref<9x3x64xbf16, #tpu.memory_space<vmem>>, vector<1x3x64xbf16>
    %6 = vector.shape_cast %5 : vector<1x3x64xbf16> to vector<3x64xbf16>
    %cst = arith.constant dense<0.000000e+00> : vector<256x64xf32>
    %7 = tpu.matmul %4, %6, %cst {dimension_numbers = #tpu.dot_dimension_numbers<[1], [0], [0], [1], [0, 0, 1, 1], [], []>} : vector<256x3xbf16>, vector<3x64xbf16>, vector<256x64xf32> -> vector<256x64xf32>
    %8 = vector.extract_strided_slice %1 {offsets = [0, 1, 0], sizes = [16, 16, 3], strides = [1, 1, 1]} : vector<18x18x3xbf16> to vector<16x16x3xbf16>
    %9 = vector.shape_cast %8 : vector<16x16x3xbf16> to vector<256x3xbf16>
    %c1 = arith.constant 1 : index
    %c0_8 = arith.constant 0 : index
    %c0_9 = arith.constant 0 : index
    %10 = vector.load %arg3[%c1, %c0_8, %c0_9] : memref<9x3x64xbf16, #tpu.memory_space<vmem>>, vector<1x3x64xbf16>
    %11 = vector.shape_cast %10 : vector<1x3x64xbf16> to vector<3x64xbf16>
    %cst_10 = arith.constant dense<0.000000e+00> : vector<256x64xf32>
    %12 = tpu.matmul %9, %11, %cst_10 {dimension_numbers = #tpu.dot_dimension_numbers<[1], [0], [0], [1], [0, 0, 1, 1], [], []>} : vector<256x3xbf16>, vector<3x64xbf16>, vector<256x64xf32> -> vector<256x64xf32>
    %13 = arith.addf %7, %12 : vector<256x64xf32>
    %14 = vector.extract_strided_slice %1 {offsets = [0, 2, 0], sizes = [16, 16, 3], strides = [1, 1, 1]} : vector<18x18x3xbf16> to vector<16x16x3xbf16>
    %15 = vector.shape_cast %14 : vector<16x16x3xbf16> to vector<256x3xbf16>
    %c2 = arith.constant 2 : index
    %c0_11 = arith.constant 0 : index
    %c0_12 = arith.constant 0 : index
    %16 = vector.load %arg3[%c2, %c0_11, %c0_12] : memref<9x3x64xbf16, #tpu.memory_space<vmem>>, vector<1x3x64xbf16>
    %17 = vector.shape_cast %16 : vector<1x3x64xbf16> to vector<3x64xbf16>
    %cst_13 = arith.constant dense<0.000000e+00> : vector<256x64xf32>
    %18 = tpu.matmul %15, %17, %cst_13 {dimension_numbers = #tpu.dot_dimension_numbers<[1], [0], [0], [1], [0, 0, 1, 1], [], []>} : vector<256x3xbf16>, vector<3x64xbf16>, vector<256x64xf32> -> vector<256x64xf32>
    %19 = arith.addf %13, %18 : vector<256x64xf32>
    %20 = vector.extract_strided_slice %1 {offsets = [1, 0, 0], sizes = [16, 16, 3], strides = [1, 1, 1]} : vector<18x18x3xbf16> to vector<16x16x3xbf16>
    %21 = vector.shape_cast %20 : vector<16x16x3xbf16> to vector<256x3xbf16>
    %c3 = arith.constant 3 : index
    %c0_14 = arith.constant 0 : index
    %c0_15 = arith.constant 0 : index
    %22 = vector.load %arg3[%c3, %c0_14, %c0_15] : memref<9x3x64xbf16, #tpu.memory_space<vmem>>, vector<1x3x64xbf16>
    %23 = vector.shape_cast %22 : vector<1x3x64xbf16> to vector<3x64xbf16>
    %cst_16 = arith.constant dense<0.000000e+00> : vector<256x64xf32>
    %24 = tpu.matmul %21, %23, %cst_16 {dimension_numbers = #tpu.dot_dimension_numbers<[1], [0], [0], [1], [0, 0, 1, 1], [], []>} : vector<256x3xbf16>, vector<3x64xbf16>, vector<256x64xf32> -> vector<256x64xf32>
    %25 = arith.addf %19, %24 : vector<256x64xf32>
    %26 = vector.extract_strided_slice %1 {offsets = [1, 1, 0], sizes = [16, 16, 3], strides = [1, 1, 1]} : vector<18x18x3xbf16> to vector<16x16x3xbf16>
    %27 = vector.shape_cast %26 : vector<16x16x3xbf16> to vector<256x3xbf16>
    %c4 = arith.constant 4 : index
    %c0_17 = arith.constant 0 : index
    %c0_18 = arith.constant 0 : index
    %28 = vector.load %arg3[%c4, %c0_17, %c0_18] : memref<9x3x64xbf16, #tpu.memory_space<vmem>>, vector<1x3x64xbf16>
    %29 = vector.shape_cast %28 : vector<1x3x64xbf16> to vector<3x64xbf16>
    %cst_19 = arith.constant dense<0.000000e+00> : vector<256x64xf32>
    %30 = tpu.matmul %27, %29, %cst_19 {dimension_numbers = #tpu.dot_dimension_numbers<[1], [0], [0], [1], [0, 0, 1, 1], [], []>} : vector<256x3xbf16>, vector<3x64xbf16>, vector<256x64xf32> -> vector<256x64xf32>
    %31 = arith.addf %25, %30 : vector<256x64xf32>
    %32 = vector.extract_strided_slice %1 {offsets = [1, 2, 0], sizes = [16, 16, 3], strides = [1, 1, 1]} : vector<18x18x3xbf16> to vector<16x16x3xbf16>
    %33 = vector.shape_cast %32 : vector<16x16x3xbf16> to vector<256x3xbf16>
    %c5 = arith.constant 5 : index
    %c0_20 = arith.constant 0 : index
    %c0_21 = arith.constant 0 : index
    %34 = vector.load %arg3[%c5, %c0_20, %c0_21] : memref<9x3x64xbf16, #tpu.memory_space<vmem>>, vector<1x3x64xbf16>
    %35 = vector.shape_cast %34 : vector<1x3x64xbf16> to vector<3x64xbf16>
    %cst_22 = arith.constant dense<0.000000e+00> : vector<256x64xf32>
    %36 = tpu.matmul %33, %35, %cst_22 {dimension_numbers = #tpu.dot_dimension_numbers<[1], [0], [0], [1], [0, 0, 1, 1], [], []>} : vector<256x3xbf16>, vector<3x64xbf16>, vector<256x64xf32> -> vector<256x64xf32>
    %37 = arith.addf %31, %36 : vector<256x64xf32>
    %38 = vector.extract_strided_slice %1 {offsets = [2, 0, 0], sizes = [16, 16, 3], strides = [1, 1, 1]} : vector<18x18x3xbf16> to vector<16x16x3xbf16>
    %39 = vector.shape_cast %38 : vector<16x16x3xbf16> to vector<256x3xbf16>
    %c6 = arith.constant 6 : index
    %c0_23 = arith.constant 0 : index
    %c0_24 = arith.constant 0 : index
    %40 = vector.load %arg3[%c6, %c0_23, %c0_24] : memref<9x3x64xbf16, #tpu.memory_space<vmem>>, vector<1x3x64xbf16>
    %41 = vector.shape_cast %40 : vector<1x3x64xbf16> to vector<3x64xbf16>
    %cst_25 = arith.constant dense<0.000000e+00> : vector<256x64xf32>
    %42 = tpu.matmul %39, %41, %cst_25 {dimension_numbers = #tpu.dot_dimension_numbers<[1], [0], [0], [1], [0, 0, 1, 1], [], []>} : vector<256x3xbf16>, vector<3x64xbf16>, vector<256x64xf32> -> vector<256x64xf32>
    %43 = arith.addf %37, %42 : vector<256x64xf32>
    %44 = vector.extract_strided_slice %1 {offsets = [2, 1, 0], sizes = [16, 16, 3], strides = [1, 1, 1]} : vector<18x18x3xbf16> to vector<16x16x3xbf16>
    %45 = vector.shape_cast %44 : vector<16x16x3xbf16> to vector<256x3xbf16>
    %c7 = arith.constant 7 : index
    %c0_26 = arith.constant 0 : index
    %c0_27 = arith.constant 0 : index
    %46 = vector.load %arg3[%c7, %c0_26, %c0_27] : memref<9x3x64xbf16, #tpu.memory_space<vmem>>, vector<1x3x64xbf16>
    %47 = vector.shape_cast %46 : vector<1x3x64xbf16> to vector<3x64xbf16>
    %cst_28 = arith.constant dense<0.000000e+00> : vector<256x64xf32>
    %48 = tpu.matmul %45, %47, %cst_28 {dimension_numbers = #tpu.dot_dimension_numbers<[1], [0], [0], [1], [0, 0, 1, 1], [], []>} : vector<256x3xbf16>, vector<3x64xbf16>, vector<256x64xf32> -> vector<256x64xf32>
    %49 = arith.addf %43, %48 : vector<256x64xf32>
    %50 = vector.extract_strided_slice %1 {offsets = [2, 2, 0], sizes = [16, 16, 3], strides = [1, 1, 1]} : vector<18x18x3xbf16> to vector<16x16x3xbf16>
    %51 = vector.shape_cast %50 : vector<16x16x3xbf16> to vector<256x3xbf16>
    %c8 = arith.constant 8 : index
    %c0_29 = arith.constant 0 : index
    %c0_30 = arith.constant 0 : index
    %52 = vector.load %arg3[%c8, %c0_29, %c0_30] : memref<9x3x64xbf16, #tpu.memory_space<vmem>>, vector<1x3x64xbf16>
    %53 = vector.shape_cast %52 : vector<1x3x64xbf16> to vector<3x64xbf16>
    %cst_31 = arith.constant dense<0.000000e+00> : vector<256x64xf32>
    %54 = tpu.matmul %51, %53, %cst_31 {dimension_numbers = #tpu.dot_dimension_numbers<[1], [0], [0], [1], [0, 0, 1, 1], [], []>} : vector<256x3xbf16>, vector<3x64xbf16>, vector<256x64xf32> -> vector<256x64xf32>
    %55 = arith.addf %49, %54 : vector<256x64xf32>
    %56 = vector.broadcast %2 : vector<1x64xf32> to vector<256x64xf32>
    %57 = arith.addf %55, %56 : vector<256x64xf32>
    %cst_32 = arith.constant 0.000000e+00 : f32
    %58 = vector.broadcast %cst_32 : f32 to vector<256x64xf32>
    %59 = arith.maximumf %57, %58 : vector<256x64xf32>
    %60 = vector.shape_cast %59 : vector<256x64xf32> to vector<16x16x64xf32>
    %61 = arith.truncf %60 : vector<16x16x64xf32> to vector<16x16x64xbf16>
    %c0_33 = arith.constant 0 : index
    %c0_34 = arith.constant 0 : index
    %c0_35 = arith.constant 0 : index
    %c0_36 = arith.constant 0 : index
    %62 = vector.load %arg5[%c0_33, %c0_34, %c0_35, %c0_36] : memref<1x16x16x64xbf16, #tpu.memory_space<vmem>>, vector<1x16x16x64xbf16>
    %63 = vector.shape_cast %62 : vector<1x16x16x64xbf16> to vector<16x16x64xbf16>
    %64 = vector.shape_cast %61 : vector<16x16x64xbf16> to vector<1x16x16x64xbf16>
    tpu.vector_store %arg5[%c0_33, %c0_34, %c0_35, %c0_36], %64 {strides = array<i32>} : memref<1x16x16x64xbf16, #tpu.memory_space<vmem>>, vector<1x16x16x64xbf16>,
    return
  }
  func.func @transform_0(%arg0: i32, %arg1: i32) -> (i32, i32, i32, i32) {
    %c0_i32 = arith.constant 0 : i32
    %c0_i32_0 = arith.constant 0 : i32
    %c0_i32_1 = arith.constant 0 : i32
    %c0_i32_2 = arith.constant 0 : i32
    return %arg1, %c0_i32, %c0_i32_0, %c0_i32_1 : i32, i32, i32, i32
  }
  func.func @transform_1(%arg0: i32, %arg1: i32) -> (i32, i32, i32) {
    %c0_i32 = arith.constant 0 : i32
    %c0_i32_0 = arith.constant 0 : i32
    %c0_i32_1 = arith.constant 0 : i32
    return %c0_i32, %c0_i32_0, %arg0 : i32, i32, i32
  }
  func.func @transform_2(%arg0: i32, %arg1: i32) -> (i32, i32) {
    %c0_i32 = arith.constant 0 : i32
    %c0_i32_0 = arith.constant 0 : i32
    return %c0_i32, %arg0 : i32, i32
  }
  func.func @transform_3(%arg0: i32, %arg1: i32) -> (i32, i32, i32, i32) {
    %c0_i32 = arith.constant 0 : i32
    %c0_i32_0 = arith.constant 0 : i32
    %c0_i32_1 = arith.constant 0 : i32
    return %arg1, %c0_i32, %c0_i32_0, %arg0 : i32, i32, i32, i32
  }
}

</mosaic_0001>

<bundles_post_ra>
// kernel: tpu_custom_call.1
= control target key start
LH: loop header
LB: loop body
LE: loop exit
PB: predicated region body
PF: predicated region fallthrough
CT: control target
= control target key end

     0   :  { %8 = vsyncpa [#allocation3], 0  ;;  %s4235_s0 = inlined_call_operand.vmem [shape: bf16[4,18,18,3], index: 0, kind: input, shape index: {}]   ;;  %s4236_s1 = inlined_call_operand.vmem [shape: bf16[9,3,64], index: 1, kind: input, shape index: {}]   ;;  %s4237_s2 = inlined_call_operand.vmem [shape: f32[1,64], index: 2, kind: input, shape index: {}]   ;;  %s4238_s3 = inlined_call_operand.hbm [shape: bf16[4,16,16,64], index: 3, kind: output, shape index: {}]  }
   0x1   :  { %10 = vsyncpa [#allocation3 + $0x1], 0  ;;  %s2983_s12 = smov 0   ;;  %s2985_s13 = smov 0  }
   0x2   :  { %s2987_s14 = smov 0   ;;  %s2989_s15 = smov 0  }
   0x3   :  { %s2991_s16 = smov 0   ;;  %s2993_s17 = smov 0  }
   0x4 LB: > { %s2534_s18 = sadd.s32 4294967295, %s2958_s17   ;;  %s2535_s19 = sadd.s32 4294967294, %s2958_s17   ;;  %s2958_s17 = sphi %s2993_s17, %s16_s17   ;;  %s2954_s16 = sphi %s2991_s16, %s4385_s16   ;;  %s2950_s15 = sphi %s2989_s15, %s4384_s15   ;;  %s2946_s14 = sphi %s2987_s14, %s4383_s14   ;;  %s2942_s13 = sphi %s2985_s13, %s4382_s13   ;;  %s2938_s12 = sphi %s2983_s12, %s4381_s12  }
   0x5   : > { %s25_s20 = sadd.s32 1, %s2954_s16  ;;  %s115_s21 = sadd.s32 1, %s2946_s14 }
   0x6   : > { %p26_p0 = scmp.ge.s32.totalorder %s25_s20, 4  ;;  %p125_p1 = scmp.ne.s32.totalorder %s2946_s14, %s2942_s13 }
   0x7   : > { %p126_p2 = scmp.eq.s32.totalorder %s2534_s18, 3  ;;  %p131_p3 = scmp.ne.s32.totalorder %s2942_s13, %s2938_s12 }
   0x8   : > { %s4387_s20 = smov (%p26_p0, %s25_s20), 0  ;;  %p132_p5 = scmp.eq.s32.totalorder %s2535_s19, 3 }
   0x9   : > { %p3023_p4 = por %p126_p2, %p125_p1  ;;  %s110_s23 = ssub.s32 %s2954_s16, %s4387_s20 }
   0xa   : > { %p2540_p6 = scmp.ge.s32.totalorder %s2958_s17, 1  ;;  %p113_p7 = scmp.eq.s32.totalorder %s110_s23, 0 }
   0xb   : > { %p3030_p8 = por %p132_p5, %p131_p3  ;;  %p171_p9 = scmp.lt.s32.totalorder %s2958_s17, 5 }
   0xc   : > { %s3036_s25 = scalar_select %p113_p7, %s2946_s14, %s115_s21  }
   0xd   : > { %p172_p10 = pnand %p2540_p6, %p171_p9 }
   0xf   : > { %175 = sbr.rel (%p172_p10) target bundleno = 773 (0x305), region = 32 }
  0x14   : > { %v2543_v0 = vld [vmem:[%s4236_s1 + $0x2] sm:$0x3]  ;;  %vm757_vm0 = vcmask 1040384   ;;  %vm758_vm1 = vcmask 1041408   ;;  %p202_p11 = scmp.lt.s32.totalorder %s2950_s15, 3  ;;  %v2960_v1 = vmov 65535  }
  0x15   : > { %v759_v2 = vsel %vm757_vm0, 4294967295, %v2960_v1  ;;  %v2656_v4 = vld [vmem:[%s4236_s1 + $0x4] sm:$0x3]  ;;  %v2673_v7 = vld [vmem:[%s4236_s1 + $0x6] sm:$0x3]  ;;  %vm708_vm5 = vcmask 23552  }
  0x16   : > { %v3042_v3 = vsel %vm758_vm1, %v759_v2, 0  ;;  %s203_s28 = scalar_select %p202_p11, %s2950_s15, 3  ;;  %v270_v8 = vld [vmem:[%s4236_s1] sm:$0x3]  ;;  %v2694_v9 = vld [vmem:[%s4236_s1 + $0x8] sm:$0x3] }
  0x17   : > { %v762_v5 = vand.u32 %v2543_v0, %v3042_v3  ;;  %v1303_v6 = vand.u32 %v2656_v4, %v3042_v3  ;;  %v1437_v10 = vand.u32 %v2673_v7, %v3042_v3  ;;  %v982_v11 = vand.u32 %v3042_v3, %v270_v8  ;;  %s199_s7 = sand.u32 1, %s2942_s13   ;;  %s2900_s30 = scalar_lea.hbm %s4238_s3, 512 }
  0x18   : > { %s2812_s10 = smul.u32 216, %s203_s28  ;;  %v1593_v12 = vand.u32 %v2694_v9, %v3042_v3  ;;  %vm271_vm2 = vsmask.f32 3328  ;;  %vm272_vm3 = vsmask.f32 7440  ;;  %vm1089_vm6 = vcmask 1042432  }
  0x19   : > { %2809 = vmatpush.bf16.msra.mxu1 %v762_v5  ;;  %2810 = vmatpush.bf16.msra.mxu2 %v762_v5  ;;  %vm3092_vm4 = vmor %vm271_vm2, %vm272_vm3  ;;  %vm1090_vm7 = vcmask 1046532   ;;  %s2541_s8 = sshll.u32 %s199_s7, 7  ;;  %vm2385_vm9 = vcmask 519168  }
  0x1a   : > { %2811 = vmatpush.bf16.msra.mxu3 %v762_v5  ;;  %771 = vmatpush.bf16.msra.mxu0 %v762_v5  ;;  %s3065_s19 = scalar_lea.vmem %s4235_s0, %s2812_s10  ;;  %vm3395_vm8 = vmor %vm1089_vm6, %vm1090_vm7  ;;  %s3993_s9 = scalar_lea.vmem [#allocation2], %s2541_s8 }
  0x1b   : > { %v3068_v13 = vld [vmem:[%s3065_s19 + $0x30] sm:$0xf]  ;;  %v3071_v14 = vld [vmem:[%s3065_s19 + $0x34] sm:$0xf]  ;;  %v3074_v15 = vld [vmem:[%s3065_s19 + $0x38] sm:$0x1] }
  0x1c   : > { %v371_v16 = vshrl.u32 %v3068_v13, 16  ;;  %v374_v17 = vshll.u32 %v3068_v13, 16  ;;  %v380_v18 = vshll.u32 %v3071_v14, 16  ;;  %v384_v19 = vshrl.u32 %v3071_v14, 16  ;;  %v239_v20 = vld [vmem:[%s3065_s19 + $0x60] sm:$0xf] }
  0x1d   : > { %1312 = vmatpush.bf16.msrb.mxu2 %v1303_v6  ;;  %991 = vmatpush.bf16.msrb.mxu1 %v982_v11  ;;  %v390_v21 = vshll.u32 %v3074_v15, 16  ;;  %v3083_v22 = vld [vmem:[%s3065_s19 + $0x64] sm:$0xf]  ;;  %v241_v23 = vld [vmem:[%s3065_s19 + $0x68] sm:$0x1]  ;;  %v467_v24 = vshrl.u32 %v239_v20, 16 }
  0x1e   : > { %1446 = vmatpush.bf16.msrb.mxu3 %v1437_v10  ;;  %1602 = vmatpush.bf16.msrb.mxu0 %v1593_v12  ;;  %v373_v25 = vrot.slane %v371_v16, 4  ;;  %v376_v26 = vrot.slane %v374_v17, 5  ;;  %v382_v27 = vrot.slane %v380_v18, 5  ;;  %v386_v28 = vrot.slane %v384_v19, 4  ;;  %v251_v29 = vld [vmem:[%s3065_s19 + $0x90] sm:$0xf] }
  0x1f   : > { %v392_v30 = vrot.slane %v390_v21, 5  ;;  %v469_v31 = vrot.slane %v467_v24, 4  ;;  %v470_v32 = vshll.u32 %v239_v20, 16  ;;  %v476_v33 = vshll.u32 %v3083_v22, 16  ;;  %v252_v38 = vld [vmem:[%s3065_s19 + $0x94] sm:$0xf] }
  0x20   : > { %v377_v34 = vor.u32 %v376_v26, %v373_v25  ;;  %v387_v35 = vor.u32 %v386_v28, %v382_v27  ;;  %v480_v36 = vshrl.u32 %v3083_v22, 16  ;;  %v486_v37 = vshll.u32 %v241_v23, 16  ;;  %v253_v48 = vld [vmem:[%s3065_s19 + $0x98] sm:$0x1]  ;;  %v3102_v0 = vld [vmem:[%s3065_s19] sm:$0xf] }
  0x21   : > { %v472_v40 = vrot.slane %v470_v32, 5  ;;  %v478_v41 = vrot.slane %v476_v33, 5  ;;  %v563_v42 = vshrl.u32 %v251_v29, 16  ;;  %v566_v50 = vshll.u32 %v251_v29, 16  ;;  %v3109_v5 = vld [vmem:[%s3065_s19 + $0x4] sm:$0xf] }
  0x22   : > { %v378_v43 = vrot.slane %v377_v34, 4  ;;  %v388_v44 = vrot.slane %v387_v35, 4  ;;  %v482_v45 = vrot.slane %v480_v36, 4  ;;  %v488_v46 = vrot.slane %v486_v37, 5  ;;  %v3112_v6 = vld [vmem:[%s3065_s19 + $0x8] sm:$0x1] }
  0x23   : > { %v473_v47 = vor.u32 %v472_v40, %v469_v31  ;;  %v565_v49 = vrot.slane %v563_v42, 4  ;;  %v572_v51 = vshll.u32 %v252_v38, 16  ;;  %v576_v55 = vshrl.u32 %v252_v38, 16  ;;  %v3131_v28 = vld [vmem:[%s3065_s19 + $0x40] sm:$0xf]  ;;  %s2808_s10 = sshll.u32 %s2950_s15, 7 }
  0x24   : > { %v383_v52 = vsel %vm3092_vm4, %v378_v43, %v382_v27  ;;  %v393_v53 = vsel %vm3092_vm4, %v388_v44, %v392_v30  ;;  %v483_v54 = vor.u32 %v482_v45, %v478_v41  ;;  %v568_v59 = vrot.slane %v566_v50, 5  ;;  %v3128_v27 = vld [vmem:[%s3065_s19 + $0x3c] sm:$0xf]  ;;  %v3136_v33 = vld [vmem:[%s3065_s19 + $0x44] sm:$0x1]  ;;  %s2432_s21 = sshll.u32 %s3993_s9, 4  ;;  %s2433_s21 = int_to_ptr.vmem [resolvable:$true] %s2432_s21 }
  0x25   : > { %v668_v56 = vunpack.c.l.b16 %v383_v52  ;;  %v669_v57 = vunpack.c.l.b16 %v393_v53  ;;  %v474_v58 = vrot.slane %v473_v47, 4  ;;  %v574_v61 = vrot.slane %v572_v51, 5  ;;  %v3144_v42 = vld [vmem:[%s3065_s19 + $0x6c] sm:$0xf]  ;;  %v3151_v51 = vld [vmem:[%s3065_s19 + $0x70] sm:$0xf] }
  0x26   : > { %v484_v60 = vrot.slane %v483_v54, 4  ;;  %v578_v62 = vrot.slane %v576_v55, 4  ;;  %v582_v63 = vshll.u32 %v253_v48, 16  ;;  %v569_v4 = vor.u32 %v568_v59, %v565_v49  ;;  %v3158_v55 = vld [vmem:[%s3065_s19 + $0x74] sm:$0x1]  ;;  %s2419_s15 = scalar_lea.sflag [#allocation3], %s199_s7 }
  0x27   : > { %v3104_v1 = vpack.c.b16 %v669_v57, %v668_v56  ;;  %v479_v2 = vsel %vm3092_vm4, %v474_v58, %v478_v41  ;;  %v275_v16 = vshrl.u32 %v3102_v0, 16  ;;  %v278_v17 = vshll.u32 %v3102_v0, 16 }
  0x28   : > { %v489_v7 = vsel %vm3092_vm4, %v484_v60, %v488_v46  ;;  %v676_v8 = vunpack.c.l.b16 %v479_v2  ;;  %v579_v9 = vor.u32 %v578_v62, %v574_v61  ;;  %v584_v10 = vrot.slane %v582_v63, 5 }
  0x29   : > { %2548 = vmatmul.msk.bf16.vlgmr.msra.gmra.mxu1 %vm708_vm5, %v3104_v1  ;;  %v677_v11 = vunpack.c.l.b16 %v489_v7  ;;  %v570_v12 = vrot.slane %v569_v4, 4  ;;  %v284_v19 = vshll.u32 %v3109_v5, 16  ;;  %v288_v20 = vshrl.u32 %v3109_v5, 16 }
  0x2a   : > { %v580_v18 = vrot.slane %v579_v9, 4  ;;  %v294_v21 = vshll.u32 %v3112_v6, 16  ;;  %v277_v25 = vrot.slane %v275_v16, 4  ;;  %v280_v26 = vrot.slane %v278_v17, 5  ;;  %v255_v17 = vld [vmem:[%s3065_s19 + $0xa0] sm:$0xf] }
  0x2b   : > { %v3123_v23 = vpack.c.b16 %v677_v11, %v676_v8  ;;  %v575_v24 = vsel %vm3092_vm4, %v570_v12, %v574_v61  ;;  %v286_v31 = vrot.slane %v284_v19, 5  ;;  %v290_v32 = vrot.slane %v288_v20, 4 }
  0x2c   : > { %v585_v29 = vsel %vm3092_vm4, %v580_v18, %v584_v10  ;;  %v684_v30 = vunpack.c.l.b16 %v575_v24  ;;  %v281_v35 = vor.u32 %v280_v26, %v277_v25  ;;  %v296_v36 = vrot.slane %v294_v21, 5  ;;  %v254_v10 = vld [vmem:[%s3065_s19 + $0x9c] sm:$0xf]  ;;  %v256_v24 = vld [vmem:[%s3065_s19 + $0xa4] sm:$0x1] }
  0x2d   : > { %4283 = vst [vmem:[#allocation5_spill] sm:$0xff] %v3123_v23  ;;  %2552 = vmatmul.msk.bf16.vlgmr.msra.gmra.mxu2 %vm708_vm5, %v3123_v23  ;;  %v685_v34 = vunpack.c.l.b16 %v585_v29  ;;  %v291_v37 = vor.u32 %v290_v32, %v286_v31  ;;  %v395_v38 = vshrl.u32 %v3128_v27, 16  ;;  %v398_v40 = vshll.u32 %v3128_v27, 16 }
  0x2e   : > { %v404_v41 = vshll.u32 %v3131_v28, 16  ;;  %v282_v44 = vrot.slane %v281_v35, 4  ;;  %v408_v45 = vshrl.u32 %v3131_v28, 16  ;;  %v414_v46 = vshll.u32 %v3136_v33, 16 }
  0x2f   : > { %v3146_v43 = vpack.c.b16 %v685_v34, %v684_v30  ;;  %v292_v47 = vrot.slane %v291_v37, 4  ;;  %v397_v48 = vrot.slane %v395_v38, 4  ;;  %v400_v49 = vrot.slane %v398_v40, 5 }
  0x30   : > { %v406_v50 = vrot.slane %v404_v41, 5  ;;  %v287_v52 = vsel %vm3092_vm4, %v282_v44, %v286_v31  ;;  %v410_v53 = vrot.slane %v408_v45, 4  ;;  %v416_v54 = vrot.slane %v414_v46, 5  ;;  %v3176_v41 = vld [vmem:[%s3065_s19 + $0xc] sm:$0xf] }
  0x31   : > { %4284 = vst [vmem:[#allocation6_spill] sm:$0xff] %v3146_v43  ;;  %2556 = vmatmul.msk.bf16.vlgmr.msra.gmra.mxu3 %vm708_vm5, %v3146_v43  ;;  %v491_v56 = vshrl.u32 %v3144_v42, 16  ;;  %v297_v57 = vsel %vm3092_vm4, %v292_v47, %v296_v36  ;;  %v660_v58 = vunpack.c.l.b16 %v287_v52  ;;  %v401_v59 = vor.u32 %v400_v49, %v397_v48  ;;  %v3183_v48 = vld [vmem:[%s3065_s19 + $0x10] sm:$0xf]  ;;  %v3352_v43 = vld [vmem:[%s3065_s19 + $0x24] sm:$0xf] }
  0x32   : > { %v494_v60 = vshll.u32 %v3144_v42, 16  ;;  %v661_v61 = vunpack.c.l.b16 %v297_v57  ;;  %v411_v62 = vor.u32 %v410_v53, %v406_v50  ;;  %v500_v2 = vshll.u32 %v3151_v51, 16  ;;  %v3186_v53 = vld [vmem:[%s3065_s19 + $0x14] sm:$0x1] }
  0x33   : > { %v493_v63 = vrot.slane %v491_v56, 4  ;;  %v402_v4 = vrot.slane %v401_v59, 4  ;;  %v504_v8 = vshrl.u32 %v3151_v51, 16  ;;  %v510_v9 = vshll.u32 %v3158_v55, 16 }
  0x34   : > { %v496_v7 = vrot.slane %v494_v60, 5  ;;  %v692_v11 = vpack.c.b16 %v661_v61, %v660_v58  ;;  %v412_v12 = vrot.slane %v411_v62, 4  ;;  %v502_v16 = vrot.slane %v500_v2, 5 }
  0x35   : > { %v407_v18 = vsel %vm3092_vm4, %v402_v4, %v406_v50  ;;  %v506_v20 = vrot.slane %v504_v8, 4  ;;  %v512_v21 = vrot.slane %v510_v9, 5  ;;  %v587_v29 = vshrl.u32 %v254_v10, 16  ;;  %v3201_v9 = vld [vmem:[%s3065_s19 + $0x4c] sm:$0xf] }
  0x36   : > { %v497_v19 = vor.u32 %v496_v7, %v493_v63  ;;  %2544 = vmatmul.msk.bf16.vlgmr.msra.gmra.mxu0 %vm708_vm5, %v692_v11  ;;  %v417_v25 = vsel %vm3092_vm4, %v412_v12, %v416_v54  ;;  %v670_v26 = vunpack.c.l.b16 %v407_v18  ;;  %v590_v30 = vshll.u32 %v254_v10, 16  ;;  %v3196_v63 = vld [vmem:[%s3065_s19 + $0x48] sm:$0xf] }
  0x37   : > { %v671_v31 = vunpack.c.l.b16 %v417_v25  ;;  %v507_v34 = vor.u32 %v506_v20, %v502_v16  ;;  %v596_v35 = vshll.u32 %v255_v17, 16  ;;  %v589_v36 = vrot.slane %v587_v29, 4 }
  0x38   : > { %v498_v32 = vrot.slane %v497_v19, 4  ;;  %v592_v37 = vrot.slane %v590_v30, 5  ;;  %v600_v38 = vshrl.u32 %v255_v17, 16  ;;  %v606_v40 = vshll.u32 %v256_v24, 16 }
  0x39   : > { %v3178_v44 = vpack.c.b16 %v671_v31, %v670_v26  ;;  %v508_v46 = vrot.slane %v507_v34, 4  ;;  %v598_v47 = vrot.slane %v596_v35, 5  ;;  %v299_v57 = vshrl.u32 %v3176_v41, 16  ;;  %v3219_v35 = vld [vmem:[%s3065_s19 + $0x78] sm:$0xf] }
  0x3a   : > { %v503_v45 = vsel %vm3092_vm4, %v498_v32, %v502_v16  ;;  %v593_v50 = vor.u32 %v592_v37, %v589_v36  ;;  %v602_v52 = vrot.slane %v600_v38, 4  ;;  %v608_v56 = vrot.slane %v606_v40, 5 }
  0x3b   : > { %v678_v49 = vunpack.c.l.b16 %v503_v45  ;;  %2549 = vmatmul.msk.bf16.gmra.mxu1 %vm708_vm5, %v3178_v44  ;;  %v513_v54 = vsel %vm3092_vm4, %v508_v46, %v512_v21  ;;  %v302_v58 = vshll.u32 %v3176_v41, 16  ;;  %v308_v62 = vshll.u32 %v3183_v48, 16  ;;  %v3208_v21 = vld [vmem:[%s3065_s19 + $0x50] sm:$0x1]  ;;  %v3223_v45 = vld [vmem:[%s3065_s19 + $0x7c] sm:$0xf] }
  0x3c   : > { %v679_v59 = vunpack.c.l.b16 %v513_v54  ;;  %v594_v60 = vrot.slane %v593_v50, 4  ;;  %v603_v61 = vor.u32 %v602_v52, %v598_v47  ;;  %v301_v2 = vrot.slane %v299_v57, 4  ;;  %v3230_v57 = vld [vmem:[%s3065_s19 + $0x80] sm:$0x1] }
  0x3d   : > { %v304_v4 = vrot.slane %v302_v58, 5  ;;  %v312_v7 = vshrl.u32 %v3183_v48, 16  ;;  %v318_v8 = vshll.u32 %v3186_v53, 16  ;;  %v310_v16 = vrot.slane %v308_v62, 5 }
  0x3e   : > { %v3203_v10 = vpack.c.b16 %v679_v59, %v678_v49  ;;  %v599_v11 = vsel %vm3092_vm4, %v594_v60, %v598_v47  ;;  %v604_v12 = vrot.slane %v603_v61, 4  ;;  %v419_v25 = vshrl.u32 %v3196_v63, 16 }
  0x3f   : > { %v686_v17 = vunpack.c.l.b16 %v599_v11  ;;  %v305_v18 = vor.u32 %v304_v4, %v301_v2  ;;  %v314_v19 = vrot.slane %v312_v7, 4  ;;  %v320_v20 = vrot.slane %v318_v8, 5 }
  0x40   : > { %2553 = vmatmul.msk.bf16.gmra.mxu2 %vm708_vm5, %v3203_v10  ;;  %v609_v24 = vsel %vm3092_vm4, %v604_v12, %v608_v56  ;;  %v422_v26 = vshll.u32 %v3196_v63, 16  ;;  %v428_v29 = vshll.u32 %v3201_v9, 16  ;;  %v432_v34 = vshrl.u32 %v3201_v9, 16 }
  0x41   : > { %v687_v30 = vunpack.c.l.b16 %v609_v24  ;;  %v306_v31 = vrot.slane %v305_v18, 4  ;;  %v315_v32 = vor.u32 %v314_v19, %v310_v16  ;;  %v421_v36 = vrot.slane %v419_v25, 4  ;;  %v3242_v18 = vld [vmem:[%s3065_s19 + $0xa8] sm:$0xf]  ;;  %v3249_v25 = vld [vmem:[%s3065_s19 + $0xac] sm:$0xf] }
  0x42   : > { %v424_v37 = vrot.slane %v422_v26, 5  ;;  %v430_v38 = vrot.slane %v428_v29, 5  ;;  %v438_v40 = vshll.u32 %v3208_v21, 16  ;;  %v434_v50 = vrot.slane %v432_v34, 4  ;;  %4286 = vst [vmem:[#allocation8_spill] sm:$0xff] %v3242_v18 }
  0x43   : > { %v3225_v46 = vpack.c.b16 %v687_v30, %v686_v17  ;;  %v311_v47 = vsel %vm3092_vm4, %v306_v31, %v310_v16  ;;  %v316_v49 = vrot.slane %v315_v32, 4  ;;  %v515_v58 = vshrl.u32 %v3219_v35, 16  ;;  %4287 = vst [vmem:[#allocation9_spill] sm:$0xff] %v3249_v25  ;;  %v3252_v26 = vld [vmem:[%s3065_s19 + $0xb0] sm:$0x1] }
  0x44   : > { %v662_v52 = vunpack.c.l.b16 %v311_v47  ;;  %v425_v54 = vor.u32 %v424_v37, %v421_v36  ;;  %v440_v56 = vrot.slane %v438_v40, 5  ;;  %v435_v60 = vor.u32 %v434_v50, %v430_v38  ;;  %4288 = vst [vmem:[#allocation10_spill] sm:$0xff] %v3252_v26 }
  0x45   : > { %4285 = vst [vmem:[#allocation7_spill] sm:$0xff] %v3225_v46  ;;  %2557 = vmatmul.msk.bf16.gmra.mxu3 %vm708_vm5, %v3225_v46  ;;  %v321_v59 = vsel %vm3092_vm4, %v316_v49, %v320_v20  ;;  %v518_v61 = vshll.u32 %v3219_v35, 16  ;;  %v524_v62 = vshll.u32 %v3223_v45, 16  ;;  %v517_v7 = vrot.slane %v515_v58, 4 }
  0x46   : > { %v663_v2 = vunpack.c.l.b16 %v321_v59  ;;  %v426_v4 = vrot.slane %v425_v54, 4  ;;  %v528_v8 = vshrl.u32 %v3223_v45, 16  ;;  %v436_v11 = vrot.slane %v435_v60, 4  ;;  %v3266_v59 = vld [vmem:[%s3065_s19 + $0x18] sm:$0xf] }
  0x47   : > { %v520_v12 = vrot.slane %v518_v61, 5  ;;  %v526_v16 = vrot.slane %v524_v62, 5  ;;  %v534_v17 = vshll.u32 %v3230_v57, 16  ;;  %v611_v37 = vshrl.u32 %v3242_v18, 16 }
  0x48   : > { %v3244_v19 = vpack.c.b16 %v663_v2, %v662_v52  ;;  %v431_v20 = vsel %vm3092_vm4, %v426_v4, %v430_v38  ;;  %v530_v24 = vrot.slane %v528_v8, 4  ;;  %v441_v29 = vsel %vm3092_vm4, %v436_v11, %v440_v56  ;;  %v3271_v2 = vld [vmem:[%s3065_s19 + $0x1c] sm:$0xf]  ;;  %v3274_v4 = vld [vmem:[%s3065_s19 + $0x20] sm:$0x1] }
  0x49   : > { %v672_v30 = vunpack.c.l.b16 %v431_v20  ;;  %v521_v31 = vor.u32 %v520_v12, %v517_v7  ;;  %v536_v32 = vrot.slane %v534_v17, 5  ;;  %v673_v34 = vunpack.c.l.b16 %v441_v29 }
  0x4a   : > { %2545 = vmatmul.msk.bf16.gmra.mxu0 %vm708_vm5, %v3244_v19  ;;  %v531_v36 = vor.u32 %v530_v24, %v526_v16  ;;  %v614_v38 = vshll.u32 %v3242_v18, 16  ;;  %v620_v47 = vshll.u32 %v3249_v25, 16  ;;  %v624_v49 = vshrl.u32 %v3249_v25, 16  ;;  %v3318_v18 = vld [vmem:[%s3065_s19 + $0x8c] sm:$0x1] }
  0x4b   : > { %v522_v40 = vrot.slane %v521_v31, 4  ;;  %v630_v50 = vshll.u32 %v3252_v26, 16  ;;  %v3263_v52 = vpack.c.b16 %v673_v34, %v672_v30  ;;  %v613_v56 = vrot.slane %v611_v37, 4  ;;  %4292 = vst [vmem:[#allocation14_spill] sm:$0xff] %v3318_v18  ;;  %v3330_v25 = vld [vmem:[%s3065_s19 + $0xb4] sm:$0xf] }
  0x4c   : > { %v532_v54 = vrot.slane %v531_v36, 4  ;;  %v616_v58 = vrot.slane %v614_v38, 5  ;;  %v622_v61 = vrot.slane %v620_v47, 5  ;;  %v626_v62 = vrot.slane %v624_v49, 4  ;;  %v3286_v36 = vld [vmem:[%s3065_s19 + $0x54] sm:$0xf] }
  0x4d   : > { %4289 = vst [vmem:[#allocation11_spill] sm:$0xff] %v3263_v52  ;;  %v527_v60 = vsel %vm3092_vm4, %v522_v40, %v526_v16  ;;  %2550 = vmatmul.msk.bf16.gmra.mxu1 %vm708_vm5, %v3263_v52  ;;  %v632_v12 = vrot.slane %v630_v50, 5  ;;  %v323_v16 = vshrl.u32 %v3266_v59, 16  ;;  %v326_v24 = vshll.u32 %v3266_v59, 16  ;;  %v3291_v47 = vld [vmem:[%s3065_s19 + $0x58] sm:$0xf] }
  0x4e   : > { %v537_v7 = vsel %vm3092_vm4, %v532_v54, %v536_v32  ;;  %v680_v8 = vunpack.c.l.b16 %v527_v60  ;;  %v617_v11 = vor.u32 %v616_v58, %v613_v56  ;;  %v627_v20 = vor.u32 %v626_v62, %v622_v61  ;;  %v3296_v58 = vld [vmem:[%s3065_s19 + $0x5c] sm:$0x1]  ;;  %4293 = vst [vmem:[#allocation15_spill] sm:$0xff] %v3330_v25 }
  0x4f   : > { %v681_v17 = vunpack.c.l.b16 %v537_v7  ;;  %v332_v30 = vshll.u32 %v3271_v2, 16  ;;  %v336_v31 = vshrl.u32 %v3271_v2, 16  ;;  %v342_v34 = vshll.u32 %v3274_v4, 16 }
  0x50   : > { %v618_v29 = vrot.slane %v617_v11, 4  ;;  %v628_v37 = vrot.slane %v627_v20, 4  ;;  %v325_v38 = vrot.slane %v323_v16, 4  ;;  %v328_v40 = vrot.slane %v326_v24, 5  ;;  %v3306_v16 = vld [vmem:[%s3065_s19 + $0x84] sm:$0xf] }
  0x51   : > { %v3288_v32 = vpack.c.b16 %v681_v17, %v680_v8  ;;  %v334_v50 = vrot.slane %v332_v30, 5  ;;  %v338_v54 = vrot.slane %v336_v31, 4  ;;  %v344_v56 = vrot.slane %v342_v34, 5  ;;  %4290 = vst [vmem:[#allocation12_spill] sm:$0xff] %v3306_v16 }
  0x52   : > { %v623_v49 = vsel %vm3092_vm4, %v618_v29, %v622_v61  ;;  %v633_v60 = vsel %vm3092_vm4, %v628_v37, %v632_v12  ;;  %v329_v7 = vor.u32 %v328_v40, %v325_v38  ;;  %v443_v8 = vshrl.u32 %v3286_v36, 16  ;;  %v3313_v40 = vld [vmem:[%s3065_s19 + $0x88] sm:$0xf] }
  0x53   : > { %2554 = vmatmul.msk.bf16.gmra.mxu2 %vm708_vm5, %v3288_v32  ;;  %v688_v62 = vunpack.c.l.b16 %v623_v49  ;;  %v689_v11 = vunpack.c.l.b16 %v633_v60  ;;  %v339_v17 = vor.u32 %v338_v54, %v334_v50  ;;  %v446_v61 = vshll.u32 %v3286_v36, 16 }
  0x54   : > { %v452_v20 = vshll.u32 %v3291_v47, 16  ;;  %v330_v24 = vrot.slane %v329_v7, 4  ;;  %v445_v29 = vrot.slane %v443_v8, 4  ;;  %v456_v30 = vshrl.u32 %v3291_v47, 16 }
  0x55   : > { %v462_v12 = vshll.u32 %v3296_v58, 16  ;;  %v3310_v31 = vpack.c.b16 %v689_v11, %v688_v62  ;;  %v340_v34 = vrot.slane %v339_v17, 4  ;;  %v448_v37 = vrot.slane %v446_v61, 5 }
  0x56   : > { %v454_v38 = vrot.slane %v452_v20, 5  ;;  %v335_v49 = vsel %vm3092_vm4, %v330_v24, %v334_v50  ;;  %v458_v54 = vrot.slane %v456_v30, 4  ;;  %v539_v7 = vshrl.u32 %v3306_v16, 16 }
  0x57   : > { %4291 = vst [vmem:[#allocation13_spill] sm:$0xff] %v3310_v31  ;;  %v464_v60 = vrot.slane %v462_v12, 5  ;;  %2558 = vmatmul.msk.bf16.gmra.mxu3 %vm708_vm5, %v3310_v31  ;;  %v345_v62 = vsel %vm3092_vm4, %v340_v34, %v344_v56  ;;  %v664_v8 = vunpack.c.l.b16 %v335_v49  ;;  %v449_v11 = vor.u32 %v448_v37, %v445_v29  ;;  %v3335_v37 = vld [vmem:[%s3065_s19 + $0xb8] sm:$0xf] }
  0x58   : > { %v542_v17 = vshll.u32 %v3306_v16, 16  ;;  %v665_v61 = vunpack.c.l.b16 %v345_v62  ;;  %v459_v50 = vor.u32 %v458_v54, %v454_v38  ;;  %v541_v20 = vrot.slane %v539_v7, 4  ;;  %4294 = vst [vmem:[#allocation16_spill] sm:$0xff] %v3335_v37  ;;  %v3363_v16 = vld [vmem:[%s3065_s19 + $0x2c] sm:$0x1] }
  0x59   : > { %v548_v24 = vshll.u32 %v3313_v40, 16  ;;  %v450_v30 = vrot.slane %v449_v11, 4  ;;  %v552_v26 = vshrl.u32 %v3313_v40, 16  ;;  %v558_v31 = vshll.u32 %v3318_v18, 16  ;;  %v3340_v11 = vld [vmem:[%s3065_s19 + $0xbc] sm:$0x1] }
  0x5a   : > { %v544_v12 = vrot.slane %v542_v17, 5  ;;  %v3332_v56 = vpack.c.b16 %v665_v61, %v664_v8  ;;  %v460_v34 = vrot.slane %v459_v50, 4  ;;  %4295 = vst [vmem:[#allocation17_spill] sm:$0xff] %v3340_v11  ;;  %v635_v61 = vshrl.u32 %v3330_v25, 16 }
  0x5b   : > { %v550_v29 = vrot.slane %v548_v24, 5  ;;  %v455_v49 = vsel %vm3092_vm4, %v450_v30, %v454_v38  ;;  %v554_v7 = vrot.slane %v552_v26, 4  ;;  %v560_v62 = vrot.slane %v558_v31, 5 }
  0x5c   : > { %v545_v54 = vor.u32 %v544_v12, %v541_v20  ;;  %2546 = vmatmul.msk.bf16.gmra.mxu0 %vm708_vm5, %v3332_v56  ;;  %v465_v8 = vsel %vm3092_vm4, %v460_v34, %v464_v60  ;;  %v674_v17 = vunpack.c.l.b16 %v455_v49  ;;  %v638_v50 = vshll.u32 %v3330_v25, 16 }
  0x5d   : > { %v675_v24 = vunpack.c.l.b16 %v465_v8  ;;  %v555_v20 = vor.u32 %v554_v7, %v550_v29  ;;  %v644_v26 = vshll.u32 %v3335_v37, 16  ;;  %v637_v31 = vrot.slane %v635_v61, 4 }
  0x5e   : > { %v546_v38 = vrot.slane %v545_v54, 4  ;;  %v640_v30 = vrot.slane %v638_v50, 5  ;;  %v648_v12 = vshrl.u32 %v3335_v37, 16  ;;  %v654_v46 = vshll.u32 %v3340_v11, 16  ;;  %v3359_v54 = vld [vmem:[%s3065_s19 + $0x28] sm:$0xf] }
  0x5f   : > { %v3354_v60 = vpack.c.b16 %v675_v24, %v674_v17  ;;  %v556_v49 = vrot.slane %v555_v20, 4  ;;  %v646_v8 = vrot.slane %v644_v26, 5  ;;  %v1097_v7 = vrot.slane %v3112_v6, 5 }
  0x60   : > { %v551_v34 = vsel %vm3092_vm4, %v546_v38, %v550_v29  ;;  %v641_v61 = vor.u32 %v640_v30, %v637_v31  ;;  %v650_v50 = vrot.slane %v648_v12, 4  ;;  %v656_v24 = vrot.slane %v654_v46, 5 }
  0x61   : > { %4296 = vst [vmem:[#allocation18_spill] sm:$0xff] %v3354_v60  ;;  %v682_v25 = vunpack.c.l.b16 %v551_v34  ;;  %2551 = vmatmul.msk.bf16.gmra.mxu1 %vm708_vm5, %v3354_v60  ;;  %v561_v17 = vsel %vm3092_vm4, %v556_v49, %v560_v62  ;;  %v347_v29 = vshrl.u32 %v3352_v43, 16  ;;  %v350_v38 = vshll.u32 %v3352_v43, 16 }
  0x62   : > { %v683_v20 = vunpack.c.l.b16 %v561_v17  ;;  %v642_v26 = vrot.slane %v641_v61, 4  ;;  %v651_v11 = vor.u32 %v650_v50, %v646_v8  ;;  %v356_v6 = vshll.u32 %v3359_v54, 16  ;;  %v2729_v61 = vld [vmem:[%s4236_s1 + $0xc] sm:$0x3]  ;;  %v2750_v50 = vld [vmem:[%s4236_s1 + $0xe] sm:$0x3] }
  0x63   : > { %v349_v31 = vrot.slane %v347_v29, 4  ;;  %v352_v30 = vrot.slane %v350_v38, 5  ;;  %v360_v12 = vshrl.u32 %v3359_v54, 16  ;;  %v366_v34 = vshll.u32 %v3363_v16, 16 }
  0x64   : > { %v3374_v37 = vpack.c.b16 %v683_v20, %v682_v25  ;;  %v647_v46 = vsel %vm3092_vm4, %v642_v26, %v646_v8  ;;  %v652_v62 = vrot.slane %v651_v11, 4  ;;  %v358_v49 = vrot.slane %v356_v6, 5  ;;  %v2712_v25 = vld [vmem:[%s4236_s1 + $0xa] sm:$0x3]  ;;  %v2768_v11 = vld [vmem:[%s4236_s1 + $0x10] sm:$0x3] }
  0x65   : > { %v690_v17 = vunpack.c.l.b16 %v647_v46  ;;  %v353_v29 = vor.u32 %v352_v30, %v349_v31  ;;  %v362_v38 = vrot.slane %v360_v12, 4  ;;  %v368_v18 = vrot.slane %v366_v34, 5 }
  0x66   : > { %4297 = vst [vmem:[#allocation19_spill] sm:$0xff] %v3374_v37  ;;  %2555 = vmatmul.msk.bf16.gmra.mxu2 %vm708_vm5, %v3374_v37  ;;  %v657_v8 = vsel %vm3092_vm4, %v652_v62, %v656_v24  ;;  %v2640_v20 = vrot.slane %v3102_v0, 9  ;;  %v1094_v12 = vrot.slane %v3109_v5, 5  ;;  %v1867_v34 = vand.u32 %v2729_v61, %v3042_v3 }
  0x67   : > { %v691_v26 = vunpack.c.l.b16 %v657_v8  ;;  %v354_v6 = vrot.slane %v353_v29, 4  ;;  %v363_v31 = vor.u32 %v362_v38, %v358_v49  ;;  %v2023_v46 = vand.u32 %v2750_v50, %v3042_v3 }
  0x68   : > { %v1733_v37 = vand.u32 %v2712_v25, %v3042_v3  ;;  %v2163_v24 = vand.u32 %v2768_v11, %v3042_v3  ;;  %v1095_v38 = vsel %vm3395_vm8, %v2640_v20, %v1094_v12  ;;  %v1096_v5 = vrot.slane %v1094_v12, 4  ;;  %1876 = vmatpush.bf16.msra.mxu2 %v1867_v34  ;;  %v2790_v20 = vld [vmem:[%s3065_s19] sm:$0xff]  ;;  %v2791_v12 = vld [vmem:[%s3065_s19 + $0xc] sm:$0xff] }
  0x69   : > { %v3404_v62 = vpack.c.b16 %v691_v26, %v690_v17  ;;  %v359_v0 = vsel %vm3092_vm4, %v354_v6, %v358_v49  ;;  %v364_v29 = vrot.slane %v363_v31, 4  ;;  %2032 = vmatpush.bf16.msra.mxu3 %v2023_v46  ;;  %v2641_v61 = vrot.slane %v3176_v41, 9  ;;  %v3441_v46 = vld [vmem:[%s3065_s19 + $0x18] sm:$0xff] }
  0x6a   : > { %v666_v8 = vunpack.c.l.b16 %v359_v0  ;;  %v1206_v50 = vunpack.c.l.b16 %v1095_v38  ;;  %1742 = vmatpush.bf16.msra.mxu1 %v1733_v37  ;;  %v1101_v49 = vrot.slane %v3183_v48, 5  ;;  %v1104_v17 = vrot.slane %v3186_v53, 5  ;;  %2172 = vmatpush.bf16.msra.mxu0 %v2163_v24 }
  0x6b   : > { %2559 = vmatmul.msk.bf16.gmra.mxu3 %vm708_vm5, %v3404_v62  ;;  %v369_v3 = vsel %vm3092_vm4, %v364_v29, %v368_v18  ;;  %v1098_v11 = vsel %vm3395_vm8, %v1096_v5, %v1097_v7  ;;  %v1108_v34 = vrot.slane %v3271_v2, 5  ;;  %v2642_v24 = vrot.slane %v3266_v59, 9  ;;  %v3461_v5 = vld [vmem:[%s3065_s19 + $0x24] sm:$0xff] }
  0x6c   : > { %v667_v25 = vunpack.c.l.b16 %v369_v3  ;;  %v1207_v41 = vunpack.c.l.b16 %v1098_v11  ;;  %v1102_v26 = vsel %vm3395_vm8, %v2641_v61, %v1101_v49  ;;  %v1103_v6 = vrot.slane %v1101_v49, 4 }
  0x6d   : > { %v1208_v37 = vunpack.c.l.b16 %v1102_v26  ;;  %v1110_v0 = vrot.slane %v1108_v34, 4  ;;  %v1111_v29 = vrot.slane %v3274_v4, 5  ;;  %v1115_v4 = vrot.slane %v3359_v54, 5 }
  0x6e   : > { %v3422_v18 = vpack.c.b16 %v667_v25, %v666_v8  ;;  %v1238_v31 = vpack.c.b16 %v1207_v41, %v1206_v50  ;;  %v1105_v48 = vsel %vm3395_vm8, %v1103_v6, %v1104_v17  ;;  %v2643_v61 = vrot.slane %v3352_v43, 9 }
  0x6f   : > { %v1209_v53 = vunpack.c.l.b16 %v1105_v48  ;;  %v1112_v2 = vsel %vm3395_vm8, %v1110_v0, %v1111_v29  ;;  %v1117_v3 = vrot.slane %v1115_v4, 4  ;;  %v1118_v50 = vrot.slane %v3363_v16, 5  ;;  %v3511_v0 = vld [vmem:[%s3065_s19 + $0x3c] sm:$0xff] }
  0x70   : > { %2547 = vmatmul.msk.bf16.gmra.mxu0 %vm708_vm5, %v3422_v18  ;;  %v1211_v8 = vunpack.c.l.b16 %v1112_v2  ;;  %v1116_v49 = vsel %vm3395_vm8, %v2643_v61, %v1115_v4  ;;  %v1122_v16 = vrot.slane %v3071_v14, 5  ;;  %v2644_v41 = vrot.slane %v3068_v13, 9 }
  0x71   : > { %2624 = vmatmul.msk.bf16.vlgmr.msrb.gmra.mxu1 %vm708_vm5, %v2790_v20  ;;  %v3429_v7 = vpack.c.b16 %v1209_v53, %v1208_v37  ;;  %v1119_v54 = vsel %vm3395_vm8, %v1117_v3, %v1118_v50  ;;  %v1212_v17 = vunpack.c.l.b16 %v1116_v49  ;;  %v3483_v20 = vld [vmem:[%s3065_s19 + $0x30] sm:$0xff]  ;;  %v1125_v6 = vrot.slane %v3074_v15, 5 }
  0x72   : > { %v1213_v25 = vunpack.c.l.b16 %v1119_v54  ;;  %v1124_v26 = vrot.slane %v1122_v16, 4  ;;  %v1123_v37 = vsel %vm3395_vm8, %v2644_v41, %v1122_v16  ;;  %v3545_v16 = vld [vmem:[%s3065_s19 + $0x48] sm:$0xff] }
  0x73   : > { %v1214_v48 = vunpack.c.l.b16 %v1123_v37  ;;  %v1139_v37 = vrot.slane %v3208_v21, 5 }
  0x74   : > { %v3475_v43 = vpack.c.b16 %v1213_v25, %v1212_v17  ;;  %v1126_v14 = vsel %vm3395_vm8, %v1124_v26, %v1125_v6  ;;  %v1136_v17 = vrot.slane %v3201_v9, 5  ;;  %v2646_v26 = vrot.slane %v3196_v63, 9 }
  0x75   : > { %v1215_v53 = vunpack.c.l.b16 %v1126_v14 }
  0x76   : > { %2657 = vmatmul.msk.bf16.vlgmr.msrb.gmra.mxu2 %vm708_vm5, %v1238_v31  ;;  %v1138_v6 = vrot.slane %v1136_v17, 4 }
  0x77   : > { %v3503_v15 = vpack.c.b16 %v1215_v53, %v1214_v48  ;;  %v1137_v48 = vsel %vm3395_vm8, %v2646_v26, %v1136_v17  ;;  %v1146_v26 = vrot.slane %v3296_v58, 5 }
  0x78   : > { %v1140_v53 = vsel %vm3395_vm8, %v1138_v6, %v1139_v37 }
  0x7b   : > { %2678 = vmatmul.msk.bf16.vlgmr.msrb.gmra.mxu3 %vm708_vm5, %v2791_v12 }
  0x80   : > { %2695 = vmatmul.msk.bf16.vlgmr.msrb.gmra.mxu0 %vm708_vm5, %v3244_v19  ;;  %v1109_v19 = vsel %vm3395_vm8, %v2642_v24, %v1108_v34  ;;  %v1129_v24 = vrot.slane %v3131_v28, 5 }
  0x81   : > { %2625 = vmatmul.msk.bf16.gmra.mxu1 %vm708_vm5, %v2791_v12  ;;  %v1210_v38 = vunpack.c.l.b16 %v1109_v19  ;;  %v2645_v19 = vrot.slane %v3128_v27, 9 }
  0x82   : > { %v1131_v2 = vrot.slane %v1129_v24, 4 }
  0x83   : > { %v3455_v59 = vpack.c.b16 %v1211_v8, %v1210_v38  ;;  %v1132_v38 = vrot.slane %v3136_v33, 5  ;;  %v1130_v28 = vsel %vm3395_vm8, %v2645_v19, %v1129_v24  ;;  %v1218_v24 = vunpack.c.l.b16 %v1137_v48 }
  0x84   : > { %v1216_v27 = vunpack.c.l.b16 %v1130_v28  ;;  %v1219_v19 = vunpack.c.l.b16 %v1140_v53 }
  0x85   : > { %v1133_v4 = vsel %vm3395_vm8, %v1131_v2, %v1132_v38  ;;  %v1143_v38 = vrot.slane %v3291_v47, 5 }
  0x86   : > { %2658 = vmatmul.msk.bf16.gmra.mxu2 %vm708_vm5, %v3429_v7  ;;  %v1217_v50 = vunpack.c.l.b16 %v1133_v4  ;;  %v3569_v2 = vpack.c.b16 %v1219_v19, %v1218_v24 }
  0x87   : > { %v1145_v17 = vrot.slane %v1143_v38, 4 }
  0x88   : > { %v3535_v49 = vpack.c.b16 %v1217_v50, %v1216_v27  ;;  %4304 = vst [vmem:[#allocation24_spill] sm:$0xff] %v3569_v2  ;;  %v3579_v27 = vld [vmem:[%s3065_s19 + $0x54] sm:$0xff]  ;;  %v2647_v50 = vrot.slane %v3286_v36, 9 }
  0x89   : > { %4305 = vst [vmem:[#allocation25_spill] sm:$0xff] %v3579_v27  ;;  %v1147_v48 = vsel %vm3395_vm8, %v1145_v17, %v1146_v26 }
  0x8a   : > { %v1144_v47 = vsel %vm3395_vm8, %v2647_v50, %v1143_v38  ;;  %v1221_v58 = vunpack.c.l.b16 %v1147_v48  ;;  %v1150_v50 = vrot.slane %v3083_v22, 5 }
  0x8b   : > { %2679 = vmatmul.msk.bf16.gmra.mxu3 %vm708_vm5, %v3441_v46  ;;  %v1220_v53 = vunpack.c.l.b16 %v1144_v47  ;;  %v2872_v47 = vld [vmem:[%s3065_s19 + $0x68] sm:$0x1] }
  0x8c   : > { %v1153_v48 = vrot.slane %v2872_v47, 5 }
  0x8d   : > { %v3601_v19 = vpack.c.b16 %v1221_v58, %v1220_v53 }
  0x8f   : > { %4307 = vst [vmem:[#allocation27_spill] sm:$0xff] %v3601_v19 }
  0x90   : > { %2696 = vmatmul.msk.bf16.gmra.mxu0 %vm708_vm5, %v3332_v56 }
  0x91   : > { %2626 = vmatmul.msk.bf16.gmra.mxu1 %vm708_vm5, %v3441_v46 }
  0x96   : > { %2659 = vmatmul.msk.bf16.gmra.mxu2 %vm708_vm5, %v3455_v59 }
  0x9b   : > { %2680 = vmatmul.msk.bf16.gmra.mxu3 %vm708_vm5, %v3461_v5 }
  0xa0   : > { %2697 = vmatmul.msk.bf16.gmra.mxu0 %vm708_vm5, %v3422_v18 }
  0xa1   : > { %2627 = vmatmul.msk.bf16.gmra.mxu1 %vm708_vm5, %v3461_v5 }
  0xa6   : > { %v3478_v11 = vpop.f32.mrf.mxu1  ;;  %2660 = vmatmul.msk.bf16.gmra.mxu2 %vm708_vm5, %v3475_v43 }
  0xab   : > { %2681 = vmatmul.msk.bf16.gmra.mxu3 %vm708_vm5, %v3483_v20 }
  0xae   : > { %v3493_v31 = vpop.f32.mrf.mxu1 }
  0xb0   : > { %v3495_v12 = vpop.f32.mrf.mxu2  ;;  %2698 = vmatmul.msk.bf16.gmra.mxu0 %vm708_vm5, %v3104_v1 }
  0xb1   : > { %2628 = vmatmul.msk.bf16.gmra.mxu1 %vm708_vm5, %v3483_v20 }
  0xb3   : > { %v3501_v13 = vpop.f32.mrf.mxu0 }
  0xb4   : > { %v3505_v34 = vpop.f32.mrf.mxu3 }
  0xb5   : > { %4300 = vst [vmem:[#allocation20_spill] sm:$0xff] %v3505_v34 }
  0xb6   : > { %2661 = vmatmul.msk.bf16.gmra.mxu2 %vm708_vm5, %v3503_v15 }
  0xb8   : > { %v3513_v29 = vpop.f32.mrf.mxu1  ;;  %v3517_v8 = vpop.f32.mrf.mxu2 }
  0xbb   : > { %2682 = vmatmul.msk.bf16.gmra.mxu3 %vm708_vm5, %v3511_v0  ;;  %v3525_v61 = vpop.f32.mrf.mxu0 }
  0xbc   : > { %v3527_v3 = vpop.f32.mrf.mxu3 }
  0xbd   : > { %4301 = vst [vmem:[#allocation21_spill] sm:$0xff] %v3527_v3 }
  0xc0   : > { %2699 = vmatmul.msk.bf16.gmra.mxu0 %vm708_vm5, %v3178_v44  ;;  %v3531_v33 = vpop.f32.mrf.mxu1 }
  0xc1   : > { %2629 = vmatmul.msk.bf16.gmra.mxu1 %vm708_vm5, %v3511_v0 }
  0xc3   : > { %v3537_v54 = vpop.f32.mrf.mxu2 }
  0xc6   : > { %2662 = vmatmul.msk.bf16.gmra.mxu2 %vm708_vm5, %v3535_v49 }
  0xc7   : > { %v3540_v25 = vpop.f32.mrf.mxu0 }
  0xc8   : > { %v3547_v41 = vpop.f32.mrf.mxu3 }
  0xc9   : > { %4302 = vst [vmem:[#allocation22_spill] sm:$0xff] %v3547_v41  ;;  %v1152_v41 = vrot.slane %v1150_v50, 4 }
  0xca   : > { %v3551_v14 = vpop.f32.mrf.mxu1 }
  0xcb   : > { %2683 = vmatmul.msk.bf16.gmra.mxu3 %vm708_vm5, %v3545_v16  ;;  %v3555_v9 = vpop.f32.mrf.mxu2  ;;  %v1154_v58 = vsel %vm3395_vm8, %v1152_v41, %v1153_v48  ;;  %v1157_v41 = vrot.slane %v3151_v51, 5 }
  0xcf   : > { %v3561_v63 = vpop.f32.mrf.mxu0 }
  0xd0   : > { %2700 = vmatmul.msk.bf16.gmra.mxu0 %vm708_vm5, %v3263_v52  ;;  %v3565_v21 = vpop.f32.mrf.mxu3 }
  0xd1   : > { %4303 = vst [vmem:[#allocation23_spill] sm:$0xff] %v3565_v21  ;;  %2630 = vmatmul.msk.bf16.gmra.mxu1 %vm708_vm5, %v3545_v16  ;;  %v2873_v21 = vld [vmem:[%s3065_s19 + $0x60] sm:$0xf] }
  0xd2   : > { %v3572_v28 = vpop.f32.mrf.mxu1 }
  0xd6   : > { %v3574_v4 = vpop.f32.mrf.mxu2  ;;  %2663 = vmatmul.msk.bf16.gmra.mxu2 %vm708_vm5, %v3569_v2 }
  0xd9   : > { %v3583_v6 = vpop.f32.mrf.mxu0 }
  0xda   : > { %v3585_v37 = vpop.f32.mrf.mxu3 }
  0xdb   : > { %4306 = vst [vmem:[#allocation26_spill] sm:$0xff] %v3585_v37  ;;  %2684 = vmatmul.msk.bf16.gmra.mxu3 %vm708_vm5, %v3579_v27  ;;  %v3614_v37 = vld [vmem:[%s3065_s19 + $0x60] sm:$0xff] }
  0xdc   : > { %4309 = vst [vmem:[#allocation29_spill] sm:$0xff] %v3614_v37 }
  0xde   : > { %v3593_v36 = vpop.f32.mrf.mxu1  ;;  %v3595_v24 = vpop.f32.mrf.mxu2 }
  0xe0   : > { %2701 = vmatmul.msk.bf16.gmra.mxu0 %vm708_vm5, %v3354_v60  ;;  %v2648_v60 = vrot.slane %v2873_v21, 9  ;;  %v1223_v21 = vunpack.c.l.b16 %v1154_v58 }
  0xe1   : > { %2631 = vmatmul.msk.bf16.gmra.mxu1 %vm708_vm5, %v3579_v27  ;;  %v3603_v38 = vpop.f32.mrf.mxu0 }
  0xe2   : > { %v3606_v17 = vpop.f32.mrf.mxu3  ;;  %v1151_v22 = vsel %vm3395_vm8, %v2648_v60, %v1150_v50 }
  0xe3   : > { %4308 = vst [vmem:[#allocation28_spill] sm:$0xff] %v3606_v17  ;;  %v1222_v27 = vunpack.c.l.b16 %v1151_v22  ;;  %v3647_v22 = vld [vmem:[%s3065_s19 + $0x6c] sm:$0xff] }
  0xe5   : > { %v3636_v60 = vpack.c.b16 %v1223_v21, %v1222_v27  ;;  %v1159_v27 = vrot.slane %v1157_v41, 4 }
  0xe6   : > { %2664 = vmatmul.msk.bf16.gmra.mxu2 %vm708_vm5, %v3601_v19  ;;  %v3610_v26 = vpop.f32.mrf.mxu1 }
  0xe7   : > { %4311 = vst [vmem:[#allocation31_spill] sm:$0xff] %v3636_v60 }
  0xe9   : > { %v3617_v53 = vpop.f32.mrf.mxu2 }
  0xeb   : > { %2685 = vmatmul.msk.bf16.gmra.mxu3 %vm708_vm5, %v3614_v37 }
  0xed   : > { %v3625_v17 = vpop.f32.mrf.mxu0 }
  0xee   : > { %v3627_v47 = vpop.f32.mrf.mxu3  ;;  %v993_v19 = vpop.f32.mrf.mxu1 }
  0xef   : > { %4310 = vst [vmem:[#allocation30_spill] sm:$0xff] %v3627_v47  ;;  %v994_v3 = vadd.f32 %v993_v19, %v3501_v13  ;;  %v1160_v19 = vrot.slane %v3158_v55, 5  ;;  %v2649_v47 = vrot.slane %v3144_v42, 9 }
  0xf0   : > { %2702 = vmatmul.msk.bf16.gmra.mxu0 %vm708_vm5, %v3123_v23 }
  0xf1   : > { %v3632_v2 = vpop.f32.mrf.mxu2  ;;  %2632 = vmatmul.msk.bf16.gmra.mxu1 %vm708_vm5, %v3614_v37  ;;  %v1158_v51 = vsel %vm3395_vm8, %v2649_v47, %v1157_v41 }
  0xf2   : > { %v1224_v52 = vunpack.c.l.b16 %v1158_v51 }
  0xf5   : > { %v3639_v50 = vpop.f32.mrf.mxu0 }
  0xf6   : > { %v3641_v48 = vpop.f32.mrf.mxu3  ;;  %2665 = vmatmul.msk.bf16.gmra.mxu2 %vm708_vm5, %v3636_v60  ;;  %v995_v13 = vpop.f32.mrf.mxu1 }
  0xf7   : > { %4312 = vst [vmem:[#allocation32_spill] sm:$0xff] %v3641_v48  ;;  %v996_v58 = vadd.f32 %v995_v13, %v3525_v61  ;;  %v1161_v48 = vsel %vm3395_vm8, %v1159_v27, %v1160_v19  ;;  %v1164_v19 = vrot.slane %v3223_v45, 5 }
  0xf8   : > { %v1225_v34 = vunpack.c.l.b16 %v1161_v48  ;;  %v1167_v48 = vrot.slane %v3230_v57, 5 }
  0xf9   : > { %v1314_v21 = vpop.f32.mrf.mxu2 }
  0xfa   : > { %v1394_v23 = vadd.f32 %v1314_v21, %v994_v3  ;;  %v3664_v13 = vpack.c.b16 %v1225_v34, %v1224_v52  ;;  %v3671_v21 = vld [vmem:[%s3065_s19 + $0x78] sm:$0xff] }
  0xfb   : > { %2686 = vmatmul.msk.bf16.gmra.mxu3 %vm708_vm5, %v3647_v22 }
  0xfd   : > { %v1604_v60 = vpop.f32.mrf.mxu0 }
  0xfe   : > { %v1448_v55 = vpop.f32.mrf.mxu3  ;;  %v998_v37 = vpop.f32.mrf.mxu1 }
  0xff   : > { %v1528_v61 = vadd.f32 %v1448_v55, %v1394_v23  ;;  %v999_v42 = vadd.f32 %v998_v37, %v3540_v25 }
 0x100   : > { %2703 = vmatmul.msk.bf16.gmra.mxu0 %vm708_vm5, %v3203_v10 }
 0x101   : > { %v1316_v3 = vpop.f32.mrf.mxu2  ;;  %2633 = vmatmul.msk.bf16.gmra.mxu1 %vm708_vm5, %v3647_v22  ;;  %v3662_v47 = vadd.f32 %v1604_v60, %v1528_v61  ;;  %v2650_v60 = vrot.slane %v3219_v35, 9 }
 0x102   : > { %v1395_v41 = vadd.f32 %v1316_v3, %v996_v58  ;;  %v1166_v58 = vrot.slane %v1164_v19, 4 }
 0x103   : > { %v1165_v57 = vsel %vm3395_vm8, %v2650_v60, %v1164_v19 }
 0x104   : > { %v1168_v55 = vsel %vm3395_vm8, %v1166_v58, %v1167_v48  ;;  %v4314_v58 = vld [vmem:[#allocation14_spill] sm:$0xff] }
 0x105   : > { %v1606_v27 = vpop.f32.mrf.mxu0 }
 0x106   : > { %v1450_v23 = vpop.f32.mrf.mxu3  ;;  %2666 = vmatmul.msk.bf16.gmra.mxu2 %vm708_vm5, %v3664_v13  ;;  %v1000_v25 = vpop.f32.mrf.mxu1 }
 0x107   : > { %v1529_v37 = vadd.f32 %v1450_v23, %v1395_v41  ;;  %v1001_v51 = vadd.f32 %v1000_v25, %v3561_v63  ;;  %v1226_v63 = vunpack.c.l.b16 %v1165_v57  ;;  %v1227_v23 = vunpack.c.l.b16 %v1168_v55  ;;  %v3697_v55 = vld [vmem:[%s3065_s19 + $0x84] sm:$0xff] }
 0x109   : > { %v1319_v52 = vpop.f32.mrf.mxu2  ;;  %v3675_v34 = vadd.f32 %v1606_v27, %v1529_v37  ;;  %v3690_v48 = vpack.c.b16 %v1227_v23, %v1226_v63  ;;  %v1171_v37 = vrot.slane %v3313_v40, 5 }
 0x10a   : > { %v1396_v45 = vadd.f32 %v1319_v52, %v999_v42  ;;  %v1174_v52 = vrot.slane %v4314_v58, 5 }
 0x10b   : > { %2687 = vmatmul.msk.bf16.gmra.mxu3 %vm708_vm5, %v3671_v21 }
 0x10d   : > { %v1609_v61 = vpop.f32.mrf.mxu0 }
 0x10e   : > { %v1453_v3 = vpop.f32.mrf.mxu3  ;;  %v1003_v41 = vpop.f32.mrf.mxu1 }
 0x10f   : > { %v1530_v35 = vadd.f32 %v1453_v3, %v1396_v45  ;;  %v1004_v27 = vadd.f32 %v1003_v41, %v3583_v6 }
 0x110   : > { %2704 = vmatmul.msk.bf16.gmra.mxu0 %vm708_vm5, %v3288_v32 }
 0x111   : > { %v1321_v42 = vpop.f32.mrf.mxu2  ;;  %2634 = vmatmul.msk.bf16.gmra.mxu1 %vm708_vm5, %v3671_v21  ;;  %v3688_v19 = vadd.f32 %v1609_v61, %v1530_v35  ;;  %v4315_v61 = vld [vmem:[#allocation12_spill] sm:$0xff] }
 0x112   : > { %v1397_v25 = vadd.f32 %v1321_v42, %v1001_v51  ;;  %v2651_v41 = vrot.slane %v4315_v61, 9  ;;  %v1173_v51 = vrot.slane %v1171_v37, 4 }
 0x113   : > { %4313 = vst [vmem:[#allocation33_spill] sm:$0xff] %v3688_v19 }
 0x114   : > { %v1172_v35 = vsel %vm3395_vm8, %v2651_v41, %v1171_v37  ;;  %v1175_v42 = vsel %vm3395_vm8, %v1173_v51, %v1174_v52  ;;  %v2874_v51 = vld [vmem:[%s3065_s19 + $0x94] sm:$0xf] }
 0x115   : > { %v1611_v60 = vpop.f32.mrf.mxu0 }
 0x116   : > { %v1455_v45 = vpop.f32.mrf.mxu3  ;;  %2667 = vmatmul.msk.bf16.gmra.mxu2 %vm708_vm5, %v3690_v48  ;;  %v1005_v6 = vpop.f32.mrf.mxu1 }
 0x117   : > { %v1531_v57 = vadd.f32 %v1455_v45, %v1397_v25  ;;  %v1006_v3 = vadd.f32 %v1005_v6, %v3603_v38  ;;  %v1228_v45 = vunpack.c.l.b16 %v1172_v35  ;;  %v1229_v6 = vunpack.c.l.b16 %v1175_v42 }
 0x119   : > { %v1324_v63 = vpop.f32.mrf.mxu2  ;;  %v3701_v23 = vadd.f32 %v1611_v60, %v1531_v57  ;;  %v3716_v41 = vpack.c.b16 %v1229_v6, %v1228_v45 }
 0x11a   : > { %v1398_v40 = vadd.f32 %v1324_v63, %v1004_v27  ;;  %v4317_v27 = vld [vmem:[#allocation19_spill] sm:$0xff]  ;;  %v1178_v63 = vrot.slane %v2874_v51, 5 }
 0x11b   : > { %4316 = vst [vmem:[#allocation14_spill] sm:$0xff] %v3701_v23  ;;  %2688 = vmatmul.msk.bf16.gmra.mxu3 %vm708_vm5, %v3697_v55  ;;  %v3723_v23 = vld [vmem:[%s3065_s19 + $0x90] sm:$0xff] }
 0x11c   : > { %4319 = vst [vmem:[#allocation34_spill] sm:$0xff] %v3716_v41 }
 0x11d   : > { %v1614_v25 = vpop.f32.mrf.mxu0  ;;  %4320 = vst [vmem:[#allocation35_spill] sm:$0xff] %v3723_v23 }
 0x11e   : > { %v1458_v38 = vpop.f32.mrf.mxu3  ;;  %v1008_v58 = vpop.f32.mrf.mxu1 }
 0x11f   : > { %v1532_v61 = vadd.f32 %v1458_v38, %v1398_v40  ;;  %v1009_v60 = vadd.f32 %v1008_v58, %v3625_v17  ;;  %v2875_v40 = vld [vmem:[%s3065_s19 + $0x98] sm:$0x1] }
 0x120   : > { %2705 = vmatmul.msk.bf16.gmra.mxu0 %vm708_vm5, %v4317_v27  ;;  %v1181_v42 = vrot.slane %v2875_v40, 5 }
 0x121   : > { %v1326_v57 = vpop.f32.mrf.mxu2  ;;  %2635 = vmatmul.msk.bf16.gmra.mxu1 %vm708_vm5, %v3697_v55  ;;  %v3714_v37 = vadd.f32 %v1614_v25, %v1532_v61  ;;  %v2876_v25 = vld [vmem:[%s3065_s19 + $0x90] sm:$0xf] }
 0x122   : > { %v1399_v52 = vadd.f32 %v1326_v57, %v1006_v3  ;;  %v2652_v61 = vrot.slane %v2876_v25, 9  ;;  %v1180_v3 = vrot.slane %v1178_v63, 4 }
 0x123   : > { %4318 = vst [vmem:[#allocation12_spill] sm:$0xff] %v3714_v37 }
 0x124   : > { %v1179_v51 = vsel %vm3395_vm8, %v2652_v61, %v1178_v63  ;;  %v2877_v61 = vld [vmem:[%s3065_s19 + $0xa0] sm:$0xf] }
 0x125   : > { %v1616_v35 = vpop.f32.mrf.mxu0 }
 0x126   : > { %v1460_v17 = vpop.f32.mrf.mxu3  ;;  %2668 = vmatmul.msk.bf16.gmra.mxu2 %vm708_vm5, %v3716_v41  ;;  %v1010_v38 = vpop.f32.mrf.mxu1  ;;  %v2879_v41 = vld [vmem:[%s3065_s19 + $0x9c] sm:$0xf] }
 0x127   : > { %v1533_v58 = vadd.f32 %v1460_v17, %v1399_v52  ;;  %v1011_v27 = vadd.f32 %v1010_v38, %v3639_v50  ;;  %v1182_v52 = vsel %vm3395_vm8, %v1180_v3, %v1181_v42  ;;  %v1230_v38 = vunpack.c.l.b16 %v1179_v51 }
 0x128   : > { %v1231_v25 = vunpack.c.l.b16 %v1182_v52  ;;  %v1185_v3 = vrot.slane %v2877_v61, 5  ;;  %v2878_v52 = vld [vmem:[%s3065_s19 + $0xa4] sm:$0x1] }
 0x129   : > { %v1329_v45 = vpop.f32.mrf.mxu2  ;;  %v3727_v6 = vadd.f32 %v1616_v35, %v1533_v58  ;;  %v4322_v35 = vld [vmem:[#allocation6_spill] sm:$0xff] }
 0x12a   : > { %v1400_v57 = vadd.f32 %v1329_v45, %v1009_v60  ;;  %v3741_v42 = vpack.c.b16 %v1231_v25, %v1230_v38 }
 0x12b   : > { %4321 = vst [vmem:[#allocation36_spill] sm:$0xff] %v3727_v6  ;;  %2689 = vmatmul.msk.bf16.gmra.mxu3 %vm708_vm5, %v3723_v23 }
 0x12c   : > { %4324 = vst [vmem:[#allocation38_spill] sm:$0xff] %v3741_v42 }
 0x12d   : > { %v1619_v40 = vpop.f32.mrf.mxu0 }
 0x12e   : > { %v1463_v17 = vpop.f32.mrf.mxu3  ;;  %v1013_v50 = vpop.f32.mrf.mxu1 }
 0x12f   : > { %v1534_v37 = vadd.f32 %v1463_v17, %v1400_v57  ;;  %v1188_v17 = vrot.slane %v2878_v52, 5 }
 0x130   : > { %2706 = vmatmul.msk.bf16.gmra.mxu0 %vm708_vm5, %v4322_v35  ;;  %v3748_v35 = vld [vmem:[%s3065_s19 + $0x9c] sm:$0xff] }
 0x131   : > { %v1331_v60 = vpop.f32.mrf.mxu2  ;;  %2636 = vmatmul.msk.bf16.gmra.mxu1 %vm708_vm5, %v3723_v23  ;;  %v3739_v63 = vadd.f32 %v1619_v40, %v1534_v37  ;;  %4325 = vst [vmem:[#allocation39_spill] sm:$0xff] %v3748_v35  ;;  %v2653_v23 = vrot.slane %v2879_v41, 9  ;;  %v1187_v37 = vrot.slane %v1185_v3, 4 }
 0x132   : > { %v1401_v58 = vadd.f32 %v1331_v60, %v1011_v27  ;;  %v1014_v27 = vadd.f32 %v1013_v50, %v3478_v11  ;;  %v4327_v50 = vld [vmem:[#allocation7_spill] sm:$0xff] }
 0x133   : > { %4323 = vst [vmem:[#allocation37_spill] sm:$0xff] %v3739_v63  ;;  %v1186_v60 = vsel %vm3395_vm8, %v2653_v23, %v1185_v3 }
 0x134   : > { %v1232_v41 = vunpack.c.l.b16 %v1186_v60 }
 0x135   : > { %v1621_v45 = vpop.f32.mrf.mxu0 }
 0x136   : > { %v1465_v51 = vpop.f32.mrf.mxu3  ;;  %2669 = vmatmul.msk.bf16.gmra.mxu2 %vm708_vm5, %v3741_v42  ;;  %v1015_v57 = vpop.f32.mrf.mxu1 }
 0x137   : > { %v1535_v6 = vadd.f32 %v1465_v51, %v1401_v58  ;;  %v1189_v58 = vsel %vm3395_vm8, %v1187_v37, %v1188_v17  ;;  %v4330_v37 = vld [vmem:[#allocation9_spill] sm:$0xff] }
 0x138   : > { %v1233_v63 = vunpack.c.l.b16 %v1189_v58  ;;  %v4331_v58 = vld [vmem:[#allocation10_spill] sm:$0xff] }
 0x139   : > { %v1334_v40 = vpop.f32.mrf.mxu2  ;;  %v3752_v38 = vadd.f32 %v1621_v45, %v1535_v6  ;;  %v1016_v6 = vadd.f32 %v1015_v57, %v3493_v31  ;;  %v3774_v57 = vld [vmem:[%s3065_s19 + $0xa8] sm:$0xff] }
 0x13a   : > { %v1402_v25 = vadd.f32 %v1334_v40, %v1014_v27  ;;  %v3767_v17 = vpack.c.b16 %v1233_v63, %v1232_v41  ;;  %v1192_v27 = vrot.slane %v4330_v37, 5  ;;  %4332 = vst [vmem:[#allocation9_spill] sm:$0xff] %v3774_v57 }
 0x13b   : > { %4326 = vst [vmem:[#allocation40_spill] sm:$0xff] %v3752_v38  ;;  %2690 = vmatmul.msk.bf16.gmra.mxu3 %vm708_vm5, %v3748_v35  ;;  %v4333_v38 = vld [vmem:[#allocation8_spill] sm:$0xff] }
 0x13c   : > { %4329 = vst [vmem:[#allocation42_spill] sm:$0xff] %v3767_v17 }
 0x13d   : > { %v1624_v61 = vpop.f32.mrf.mxu0 }
 0x13e   : > { %v1468_v51 = vpop.f32.mrf.mxu3  ;;  %v1018_v52 = vpop.f32.mrf.mxu1 }
 0x13f   : > { %v1536_v11 = vadd.f32 %v1468_v51, %v1402_v25  ;;  %v1195_v51 = vrot.slane %v4331_v58, 5 }
 0x140   : > { %2707 = vmatmul.msk.bf16.gmra.mxu0 %vm708_vm5, %v4327_v50  ;;  %v2654_v50 = vrot.slane %v4333_v38, 9 }
 0x141   : > { %v1336_v45 = vpop.f32.mrf.mxu2  ;;  %2637 = vmatmul.msk.bf16.gmra.mxu1 %vm708_vm5, %v3748_v35  ;;  %v3765_v23 = vadd.f32 %v1624_v61, %v1536_v11  ;;  %v1194_v61 = vrot.slane %v1192_v27, 4  ;;  %v1019_v11 = vadd.f32 %v1018_v52, %v3513_v29 }
 0x142   : > { %v1403_v3 = vadd.f32 %v1336_v45, %v1016_v6  ;;  %v1193_v45 = vsel %vm3395_vm8, %v2654_v50, %v1192_v27  ;;  %v3792_v50 = vld [vmem:[%s3065_s19 + $0xc0] sm:$0xf] }
 0x143   : > { %4328 = vst [vmem:[#allocation41_spill] sm:$0xff] %v3765_v23  ;;  %v1234_v58 = vunpack.c.l.b16 %v1193_v45  ;;  %v4335_v23 = vld [vmem:[#allocation13_spill] sm:$0xff]  ;;  %v1561_v45 = vshrl.u32 %v3792_v50, 16 }
 0x144   : > { %4336 = vst [vmem:[#allocation8_spill] sm:$0xff] %v3792_v50 }
 0x145   : > { %v1626_v40 = vpop.f32.mrf.mxu0 }
 0x146   : > { %v1470_v60 = vpop.f32.mrf.mxu3  ;;  %2670 = vmatmul.msk.bf16.gmra.mxu2 %vm708_vm5, %v3767_v17  ;;  %v1020_v25 = vpop.f32.mrf.mxu1 }
 0x147   : > { %v1537_v31 = vadd.f32 %v1470_v60, %v1403_v3  ;;  %v1196_v3 = vsel %vm3395_vm8, %v1194_v61, %v1195_v51 }
 0x148   : > { %v1235_v29 = vunpack.c.l.b16 %v1196_v3 }
 0x149   : > { %v1339_v63 = vpop.f32.mrf.mxu2  ;;  %v3778_v41 = vadd.f32 %v1626_v40, %v1537_v31  ;;  %v1021_v40 = vadd.f32 %v1020_v25, %v3531_v33  ;;  %v1564_v33 = vshll.u32 %v3792_v50, 16 }
 0x14a   : > { %v1404_v6 = vadd.f32 %v1339_v63, %v1019_v11  ;;  %v3796_v61 = vpack.c.b16 %v1235_v29, %v1234_v58  ;;  %v3799_v11 = vld [vmem:[%s3065_s19 + $0xc4] sm:$0xf]  ;;  %v4340_v63 = vld [vmem:[#allocation16_spill] sm:$0xff] }
 0x14b   : > { %4334 = vst [vmem:[#allocation10_spill] sm:$0xff] %v3778_v41  ;;  %2691 = vmatmul.msk.bf16.gmra.mxu3 %vm708_vm5, %v3774_v57  ;;  %v1570_v25 = vshll.u32 %v3799_v11, 16  ;;  %v4341_v58 = vld [vmem:[#allocation17_spill] sm:$0xff]  ;;  %v1566_v17 = vrot.slane %v1564_v33, 5 }
 0x14c   : > { %4338 = vst [vmem:[#allocation44_spill] sm:$0xff] %v3796_v61  ;;  %v1202_v29 = vrot.slane %v4341_v58, 5 }
 0x14d   : > { %v1629_v37 = vpop.f32.mrf.mxu0  ;;  %4339 = vst [vmem:[#allocation45_spill] sm:$0xff] %v3799_v11 }
 0x14e   : > { %v1473_v38 = vpop.f32.mrf.mxu3  ;;  %v1023_v60 = vpop.f32.mrf.mxu1 }
 0x14f   : > { %v1538_v52 = vadd.f32 %v1473_v38, %v1404_v6  ;;  %v1199_v6 = vrot.slane %v4340_v63, 5  ;;  %v1574_v38 = vshrl.u32 %v3799_v11, 16  ;;  %v1024_v50 = vadd.f32 %v1023_v60, %v3551_v14 }
 0x150   : > { %2708 = vmatmul.msk.bf16.gmra.mxu0 %vm708_vm5, %v4335_v23  ;;  %v1563_v23 = vrot.slane %v1561_v45, 4  ;;  %v1572_v11 = vrot.slane %v1570_v25, 5 }
 0x151   : > { %v1341_v31 = vpop.f32.mrf.mxu2  ;;  %2638 = vmatmul.msk.bf16.gmra.mxu1 %vm708_vm5, %v3774_v57  ;;  %v3794_v27 = vadd.f32 %v1629_v37, %v1538_v52  ;;  %v1576_v35 = vrot.slane %v1574_v38, 4 }
 0x152   : > { %v1405_v51 = vadd.f32 %v1341_v31, %v1021_v40  ;;  %v3810_v40 = vld [vmem:[%s3065_s19 + $0xb4] sm:$0xff]  ;;  %v1567_v60 = vor.u32 %v1566_v17, %v1563_v23 }
 0x153   : > { %4337 = vst [vmem:[#allocation43_spill] sm:$0xff] %v3794_v27  ;;  %v4342_v31 = vld [vmem:[#allocation15_spill] sm:$0xff]  ;;  %v1201_v27 = vrot.slane %v1199_v6, 4  ;;  %v1577_v45 = vor.u32 %v1576_v35, %v1572_v11 }
 0x154   : > { %v2655_v63 = vrot.slane %v4342_v31, 9 }
 0x155   : > { %v1631_v3 = vpop.f32.mrf.mxu0  ;;  %v1578_v23 = vrot.slane %v1577_v45, 4 }
 0x156   : > { %v1475_v41 = vpop.f32.mrf.mxu3  ;;  %2671 = vmatmul.msk.bf16.gmra.mxu2 %vm708_vm5, %v3796_v61  ;;  %v1025_v37 = vpop.f32.mrf.mxu1  ;;  %v3817_v61 = vld [vmem:[%s3065_s19 + $0xc8] sm:$0x1] }
 0x157   : > { %v1539_v52 = vadd.f32 %v1475_v41, %v1405_v51  ;;  %v1200_v41 = vsel %vm3395_vm8, %v2655_v63, %v1199_v6  ;;  %v1203_v51 = vsel %vm3395_vm8, %v1201_v27, %v1202_v29  ;;  %v1580_v33 = vshll.u32 %v3817_v61, 16 }
 0x158   : > { %v1236_v38 = vunpack.c.l.b16 %v1200_v41  ;;  %v1026_v58 = vadd.f32 %v1025_v37, %v3572_v28  ;;  %v1568_v27 = vrot.slane %v1567_v60, 4 }
 0x159   : > { %v1344_v57 = vpop.f32.mrf.mxu2  ;;  %v3814_v42 = vadd.f32 %v1631_v3, %v1539_v52  ;;  %v1582_v35 = vrot.slane %v1580_v33, 5 }
 0x15a   : > { %v1406_v19 = vadd.f32 %v1344_v57, %v1024_v50  ;;  %v1237_v57 = vunpack.c.l.b16 %v1203_v51  ;;  %v3842_v51 = vld [vmem:[%s3065_s19 + $0xc0] sm:$0xff] }
 0x15b   : > { %2692 = vmatmul.msk.bf16.gmra.mxu3 %vm708_vm5, %v3810_v40  ;;  %v1583_v28 = vsel %vm3092_vm4, %v1578_v23, %v1582_v35 }
 0x15c   : > { %v3833_v52 = vpack.c.b16 %v1237_v57, %v1236_v38  ;;  %v1587_v45 = vunpack.c.l.b16 %v1583_v28 }
 0x15d   : > { %v1634_v14 = vpop.f32.mrf.mxu0 }
 0x15e   : > { %v1478_v25 = vpop.f32.mrf.mxu3  ;;  %v1028_v3 = vpop.f32.mrf.mxu1 }
 0x15f   : > { %v1540_v50 = vadd.f32 %v1478_v25, %v1406_v19  ;;  %v1573_v19 = vsel %vm3092_vm4, %v1568_v27, %v1572_v11 }
 0x160   : > { %2709 = vmatmul.msk.bf16.gmra.mxu0 %vm708_vm5, %v3404_v62  ;;  %v1586_v60 = vunpack.c.l.b16 %v1573_v19 }
 0x161   : > { %v1346_v6 = vpop.f32.mrf.mxu2  ;;  %2639 = vmatmul.msk.bf16.gmra.mxu1 %vm708_vm5, %v3810_v40  ;;  %v3831_v17 = vadd.f32 %v1634_v14, %v1540_v50  ;;  %v1029_v14 = vadd.f32 %v1028_v3, %v3593_v36 }
 0x162   : > { %v1407_v29 = vadd.f32 %v1346_v6, %v1026_v58  ;;  %v3849_v11 = vpack.c.b16 %v1587_v45, %v1586_v60 }
 0x165   : > { %v1636_v31 = vpop.f32.mrf.mxu0 }
 0x166   : > { %v1480_v37 = vpop.f32.mrf.mxu3  ;;  %2672 = vmatmul.msk.bf16.gmra.mxu2 %vm708_vm5, %v3833_v52  ;;  %v1030_v63 = vpop.f32.mrf.mxu1 }
 0x167   : > { %v1541_v41 = vadd.f32 %v1480_v37, %v1407_v29  ;;  %v1031_v36 = vadd.f32 %v1030_v63, %v3610_v26 }
 0x169   : > { %v1349_v33 = vpop.f32.mrf.mxu2  ;;  %v3845_v25 = vadd.f32 %v1636_v31, %v1541_v41 }
 0x16a   : > { %v1408_v38 = vadd.f32 %v1349_v33, %v1029_v14 }
 0x16b   : > { %2693 = vmatmul.msk.bf16.gmra.mxu3 %vm708_vm5, %v3842_v51 }
 0x16d   : > { %v1639_v57 = vpop.f32.mrf.mxu0 }
 0x16e   : > { %v1483_v50 = vpop.f32.mrf.mxu3  ;;  %v1033_v58 = vpop.f32.mrf.mxu1 }
 0x16f   : > { %v1542_v6 = vadd.f32 %v1483_v50, %v1408_v38  ;;  %v1034_v28 = vadd.f32 %v1033_v58, %v3495_v12 }
 0x170   : > { %2710 = vmatmul.msk.bf16.gmra.mxu0 %vm708_vm5, %v3849_v11 }
 0x171   : > { %v1351_v3 = vpop.f32.mrf.mxu2  ;;  %2713 = vmatmul.msk.bf16.vlgmr.msra.gmra.mxu1 %vm708_vm5, %v3429_v7  ;;  %v3856_v27 = vadd.f32 %v1639_v57, %v1542_v6 }
 0x172   : > { %v1409_v23 = vadd.f32 %v1351_v3, %v1031_v36 }
 0x175   : > { %v1641_v35 = vpop.f32.mrf.mxu0 }
 0x176   : > { %v1485_v29 = vpop.f32.mrf.mxu3  ;;  %2734 = vmatmul.msk.bf16.vlgmr.msra.gmra.mxu2 %vm708_vm5, %v3441_v46  ;;  %v1035_v31 = vpop.f32.mrf.mxu1 }
 0x177   : > { %v1543_v19 = vadd.f32 %v1485_v29, %v1409_v23  ;;  %v1036_v46 = vadd.f32 %v1035_v31, %v3517_v8 }
 0x179   : > { %v1354_v37 = vpop.f32.mrf.mxu2  ;;  %v3861_v41 = vadd.f32 %v1641_v35, %v1543_v19 }
 0x17a   : > { %v1410_v26 = vadd.f32 %v1354_v37, %v1034_v28 }
 0x17b   : > { %2751 = vmatmul.msk.bf16.vlgmr.msra.gmra.mxu3 %vm708_vm5, %v3332_v56 }
 0x17d   : > { %v1644_v7 = vpop.f32.mrf.mxu0 }
 0x17e   : > { %v1488_v63 = vpop.f32.mrf.mxu3  ;;  %v1038_v14 = vpop.f32.mrf.mxu1 }
 0x17f   : > { %v1544_v60 = vadd.f32 %v1488_v63, %v1410_v26  ;;  %v1039_v58 = vadd.f32 %v1038_v14, %v3537_v54 }
 0x180   : > { %2769 = vmatmul.msk.bf16.vlgmr.msra.gmra.mxu0 %vm708_vm5, %v3455_v59 }
 0x181   : > { %v1356_v45 = vpop.f32.mrf.mxu2  ;;  %2714 = vmatmul.msk.bf16.gmra.mxu1 %vm708_vm5, %v3455_v59  ;;  %v3870_v12 = vadd.f32 %v1644_v7, %v1544_v60 }
 0x182   : > { %v1411_v33 = vadd.f32 %v1356_v45, %v1036_v46 }
 0x185   : > { %v1646_v38 = vpop.f32.mrf.mxu0 }
 0x186   : > { %v1490_v57 = vpop.f32.mrf.mxu3  ;;  %2735 = vmatmul.msk.bf16.gmra.mxu2 %vm708_vm5, %v3461_v5  ;;  %v1040_v56 = vpop.f32.mrf.mxu1 }
 0x187   : > { %v1545_v50 = vadd.f32 %v1490_v57, %v1411_v33  ;;  %v1041_v5 = vadd.f32 %v1040_v56, %v3555_v9 }
 0x189   : > { %v1359_v6 = vpop.f32.mrf.mxu2  ;;  %v3875_v36 = vadd.f32 %v1646_v38, %v1545_v50 }
 0x18a   : > { %v1412_v8 = vadd.f32 %v1359_v6, %v1039_v58 }
 0x18b   : > { %2752 = vmatmul.msk.bf16.gmra.mxu3 %vm708_vm5, %v3422_v18 }
 0x18d   : > { %v1649_v59 = vpop.f32.mrf.mxu0 }
 0x18e   : > { %v1493_v3 = vpop.f32.mrf.mxu3  ;;  %v1043_v23 = vpop.f32.mrf.mxu1 }
 0x18f   : > { %v1546_v35 = vadd.f32 %v1493_v3, %v1412_v8  ;;  %v1044_v26 = vadd.f32 %v1043_v23, %v3574_v4 }
 0x190   : > { %2770 = vmatmul.msk.bf16.gmra.mxu0 %vm708_vm5, %v3475_v43 }
 0x191   : > { %v1361_v29 = vpop.f32.mrf.mxu2  ;;  %2715 = vmatmul.msk.bf16.gmra.mxu1 %vm708_vm5, %v3475_v43  ;;  %v3884_v54 = vadd.f32 %v1649_v59, %v1546_v35 }
 0x192   : > { %v1413_v31 = vadd.f32 %v1361_v29, %v1041_v5 }
 0x195   : > { %v1651_v19 = vpop.f32.mrf.mxu0 }
 0x196   : > { %v1495_v28 = vpop.f32.mrf.mxu3  ;;  %2736 = vmatmul.msk.bf16.gmra.mxu2 %vm708_vm5, %v3483_v20  ;;  %v1045_v18 = vpop.f32.mrf.mxu1 }
 0x197   : > { %v1547_v37 = vadd.f32 %v1495_v28, %v1413_v31  ;;  %v1046_v20 = vadd.f32 %v1045_v18, %v3595_v24 }
 0x199   : > { %v1364_v7 = vpop.f32.mrf.mxu2  ;;  %v3889_v63 = vadd.f32 %v1651_v19, %v1547_v37  ;;  %v4343_v19 = vld [vmem:[#allocation20_spill] sm:$0xff] }
 0x19a   : > { %v1414_v9 = vadd.f32 %v1364_v7, %v1044_v26  ;;  %v4344_v26 = vld [vmem:[#allocation11_spill] sm:$0xff] }
 0x19b   : > { %2753 = vmatmul.msk.bf16.gmra.mxu3 %vm708_vm5, %v3104_v1 }
 0x19d   : > { %v1654_v43 = vpop.f32.mrf.mxu0 }
 0x19e   : > { %v1498_v14 = vpop.f32.mrf.mxu3  ;;  %v1048_v60 = vpop.f32.mrf.mxu1 }
 0x19f   : > { %v1548_v46 = vadd.f32 %v1498_v14, %v1414_v9  ;;  %v1049_v50 = vadd.f32 %v1048_v60, %v3617_v53  ;;  %v4345_v14 = vld [vmem:[#allocation24_spill] sm:$0xff]  ;;  %v4346_v60 = vld [vmem:[#allocation21_spill] sm:$0xff] }
 0x1a0   : > { %2771 = vmatmul.msk.bf16.gmra.mxu0 %vm708_vm5, %v3503_v15 }
 0x1a1   : > { %v1366_v45 = vpop.f32.mrf.mxu2  ;;  %2716 = vmatmul.msk.bf16.gmra.mxu1 %vm708_vm5, %v3503_v15  ;;  %v3898_v4 = vadd.f32 %v1654_v43, %v1548_v46 }
 0x1a2   : > { %v1415_v33 = vadd.f32 %v1366_v45, %v1046_v20 }
 0x1a5   : > { %v1656_v38 = vpop.f32.mrf.mxu0 }
 0x1a6   : > { %v1500_v57 = vpop.f32.mrf.mxu3  ;;  %2737 = vmatmul.msk.bf16.gmra.mxu2 %vm708_vm5, %v3511_v0  ;;  %v1050_v1 = vpop.f32.mrf.mxu1 }
 0x1a7   : > { %v1549_v56 = vadd.f32 %v1500_v57, %v1415_v33  ;;  %v1051_v0 = vadd.f32 %v1050_v1, %v3632_v2  ;;  %v4347_v57 = vld [vmem:[#allocation25_spill] sm:$0xff] }
 0x1a9   : > { %v1369_v58 = vpop.f32.mrf.mxu2  ;;  %v3903_v6 = vadd.f32 %v1656_v38, %v1549_v56 }
 0x1aa   : > { %v1416_v24 = vadd.f32 %v1369_v58, %v1049_v50  ;;  %v4348_v50 = vld [vmem:[#allocation22_spill] sm:$0xff] }
 0x1ab   : > { %2754 = vmatmul.msk.bf16.gmra.mxu3 %vm708_vm5, %v3178_v44 }
 0x1ad   : > { %v1659_v15 = vpop.f32.mrf.mxu0 }
 0x1ae   : > { %v1503_v8 = vpop.f32.mrf.mxu3  ;;  %v1053_v59 = vpop.f32.mrf.mxu1 }
 0x1af   : > { %v1550_v3 = vadd.f32 %v1503_v8, %v1416_v24  ;;  %v1054_v28 = vadd.f32 %v1053_v59, %v4343_v19  ;;  %v4349_v59 = vld [vmem:[#allocation18_spill] sm:$0xff] }
 0x1b0   : > { %2772 = vmatmul.msk.bf16.gmra.mxu0 %vm708_vm5, %v3535_v49 }
 0x1b1   : > { %v1371_v23 = vpop.f32.mrf.mxu2  ;;  %2717 = vmatmul.msk.bf16.gmra.mxu1 %vm708_vm5, %v3535_v49  ;;  %v3912_v53 = vadd.f32 %v1659_v15, %v1550_v3 }
 0x1b2   : > { %v1417_v35 = vadd.f32 %v1371_v23, %v1051_v0 }
 0x1b5   : > { %v1661_v5 = vpop.f32.mrf.mxu0 }
 0x1b6   : > { %v1505_v29 = vpop.f32.mrf.mxu3  ;;  %2738 = vmatmul.msk.bf16.gmra.mxu2 %vm708_vm5, %v3545_v16  ;;  %v1055_v44 = vpop.f32.mrf.mxu1 }
 0x1b7   : > { %v1551_v31 = vadd.f32 %v1505_v29, %v1417_v35  ;;  %v1056_v16 = vadd.f32 %v1055_v44, %v4346_v60  ;;  %v4351_v29 = vld [vmem:[#allocation23_spill] sm:$0xff] }
 0x1b9   : > { %v1374_v18 = vpop.f32.mrf.mxu2  ;;  %v3917_v37 = vadd.f32 %v1661_v5, %v1551_v31  ;;  %v4350_v5 = vld [vmem:[#allocation27_spill] sm:$0xff] }
 0x1ba   : > { %v1418_v2 = vadd.f32 %v1374_v18, %v1054_v28 }
 0x1bb   : > { %2755 = vmatmul.msk.bf16.gmra.mxu3 %vm708_vm5, %v4344_v26  ;;  %v4352_v26 = vld [vmem:[#allocation29_spill] sm:$0xff] }
 0x1bd   : > { %v1664_v49 = vpop.f32.mrf.mxu0 }
 0x1be   : > { %v1508_v7 = vpop.f32.mrf.mxu3  ;;  %v1058_v9 = vpop.f32.mrf.mxu1 }
 0x1bf   : > { %v1552_v43 = vadd.f32 %v1508_v7, %v1418_v2  ;;  %v1059_v58 = vadd.f32 %v1058_v9, %v4348_v50  ;;  %v4353_v9 = vld [vmem:[#allocation26_spill] sm:$0xff] }
 0x1c0   : > { %2773 = vmatmul.msk.bf16.gmra.mxu0 %vm708_vm5, %v4345_v14 }
 0x1c1   : > { %v1376_v46 = vpop.f32.mrf.mxu2  ;;  %2718 = vmatmul.msk.bf16.gmra.mxu1 %vm708_vm5, %v4345_v14  ;;  %v3926_v20 = vadd.f32 %v1664_v49, %v1552_v43 }
 0x1c2   : > { %v1419_v45 = vadd.f32 %v1376_v46, %v1056_v16  ;;  %v4354_v46 = vld [vmem:[#allocation5_spill] sm:$0xff] }
 0x1c5   : > { %v1666_v33 = vpop.f32.mrf.mxu0 }
 0x1c6   : > { %v1510_v38 = vpop.f32.mrf.mxu3  ;;  %2739 = vmatmul.msk.bf16.gmra.mxu2 %vm708_vm5, %v4347_v57  ;;  %v1060_v1 = vpop.f32.mrf.mxu1 }
 0x1c7   : > { %v1553_v56 = vadd.f32 %v1510_v38, %v1419_v45  ;;  %v1061_v44 = vadd.f32 %v1060_v1, %v4351_v29  ;;  %v4355_v1 = vld [vmem:[#allocation31_spill] sm:$0xff] }
 0x1c9   : > { %v1379_v24 = vpop.f32.mrf.mxu2  ;;  %v3931_v15 = vadd.f32 %v1666_v33, %v1553_v56  ;;  %v4356_v56 = vld [vmem:[#allocation28_spill] sm:$0xff] }
 0x1ca   : > { %v1420_v8 = vadd.f32 %v1379_v24, %v1059_v58 }
 0x1cb   : > { %2756 = vmatmul.msk.bf16.gmra.mxu3 %vm708_vm5, %v4349_v59 }
 0x1cd   : > { %v1669_v3 = vpop.f32.mrf.mxu0 }
 0x1ce   : > { %v1513_v0 = vpop.f32.mrf.mxu3  ;;  %v1063_v23 = vpop.f32.mrf.mxu1 }
 0x1cf   : > { %v1554_v35 = vadd.f32 %v1513_v0, %v1420_v8  ;;  %v1064_v43 = vadd.f32 %v1063_v23, %v4353_v9 }
 0x1d0   : > { %2774 = vmatmul.msk.bf16.gmra.mxu0 %vm708_vm5, %v4350_v5 }
 0x1d1   : > { %v1381_v31 = vpop.f32.mrf.mxu2  ;;  %2719 = vmatmul.msk.bf16.gmra.mxu1 %vm708_vm5, %v4350_v5  ;;  %v3940_v19 = vadd.f32 %v1669_v3, %v1554_v35  ;;  %v4357_v35 = vld [vmem:[#allocation30_spill] sm:$0xff] }
 0x1d2   : > { %v1421_v28 = vadd.f32 %v1381_v31, %v1061_v44 }
 0x1d5   : > { %v1671_v18 = vpop.f32.mrf.mxu0 }
 0x1d6   : > { %v1515_v2 = vpop.f32.mrf.mxu3  ;;  %2740 = vmatmul.msk.bf16.gmra.mxu2 %vm708_vm5, %v4352_v26  ;;  %v1065_v49 = vpop.f32.mrf.mxu1 }
 0x1d7   : > { %v1555_v7 = vadd.f32 %v1515_v2, %v1421_v28  ;;  %v1066_v50 = vadd.f32 %v1065_v49, %v4356_v56  ;;  %v4358_v49 = vld [vmem:[#allocation32_spill] sm:$0xff] }
 0x1d9   : > { %v1384_v14 = vpop.f32.mrf.mxu2  ;;  %v3945_v60 = vadd.f32 %v1671_v18, %v1555_v7 }
 0x1da   : > { %v1422_v16 = vadd.f32 %v1384_v14, %v1064_v43 }
 0x1db   : > { %2757 = vmatmul.msk.bf16.gmra.mxu3 %vm708_vm5, %v4354_v46 }
 0x1dd   : > { %v1674_v45 = vpop.f32.mrf.mxu0 }
 0x1de   : > { %v1518_v33 = vpop.f32.mrf.mxu3  ;;  %v1068_v38 = vpop.f32.mrf.mxu1 }
 0x1df   : > { %v1556_v57 = vadd.f32 %v1518_v33, %v1422_v16  ;;  %v1069_v5 = vadd.f32 %v1068_v38, %v4357_v35 }
 0x1e0   : > { %2775 = vmatmul.msk.bf16.gmra.mxu0 %vm708_vm5, %v4355_v1 }
 0x1e1   : > { %v1386_v58 = vpop.f32.mrf.mxu2  ;;  %2720 = vmatmul.msk.bf16.gmra.mxu1 %vm708_vm5, %v4355_v1  ;;  %v3954_v24 = vadd.f32 %v1674_v45, %v1556_v57 }
 0x1e2   : > { %v1423_v8 = vadd.f32 %v1386_v58, %v1066_v50 }
 0x1e5   : > { %v1676_v59 = vpop.f32.mrf.mxu0 }
 0x1e6   : > { %v1520_v3 = vpop.f32.mrf.mxu3  ;;  %2741 = vmatmul.msk.bf16.gmra.mxu2 %vm708_vm5, %v3647_v22  ;;  %v1070_v0 = vpop.f32.mrf.mxu1 }
 0x1e7   : > { %v1557_v23 = vadd.f32 %v1520_v3, %v1423_v8  ;;  %v1071_v22 = vadd.f32 %v1070_v0, %v4358_v49 }
 0x1e9   : > { %v1389_v29 = vpop.f32.mrf.mxu2  ;;  %v3959_v44 = vadd.f32 %v1676_v59, %v1557_v23 }
 0x1ea   : > { %v1424_v31 = vadd.f32 %v1389_v29, %v1069_v5 }
 0x1eb   : > { %2758 = vmatmul.msk.bf16.gmra.mxu3 %vm708_vm5, %v3203_v10 }
 0x1ed   : > { %v1679_v28 = vpop.f32.mrf.mxu0 }
 0x1ee   : > { %v1523_v18 = vpop.f32.mrf.mxu3  ;;  %v1744_v2 = vpop.f32.mrf.mxu1 }
 0x1ef   : > { %v1558_v26 = vadd.f32 %v1523_v18, %v1424_v31  ;;  %v1824_v45 = vadd.f32 %v1744_v2, %v3662_v47  ;;  %v4360_v2 = vld [vmem:[#allocation19_spill] sm:$0xff] }
 0x1f0   : > { %2776 = vmatmul.msk.bf16.gmra.mxu0 %vm708_vm5, %v3664_v13 }
 0x1f1   : > { %v1391_v7 = vpop.f32.mrf.mxu2  ;;  %2721 = vmatmul.msk.bf16.gmra.mxu1 %vm708_vm5, %v3664_v13  ;;  %v3968_v9 = vadd.f32 %v1679_v28, %v1558_v26 }
 0x1f2   : > { %v1425_v43 = vadd.f32 %v1391_v7, %v1071_v22 }
 0x1f5   : > { %v1681_v14 = vpop.f32.mrf.mxu0 }
 0x1f6   : > { %v1525_v16 = vpop.f32.mrf.mxu3  ;;  %2742 = vmatmul.msk.bf16.gmra.mxu2 %vm708_vm5, %v3671_v21  ;;  %v1746_v10 = vpop.f32.mrf.mxu1  ;;  %v3980_v21 = vld [vmem:[%s4237_s2] ss:$0 sm:$0xff] }
 0x1f7   : > { %v1559_v46 = vadd.f32 %v1525_v16, %v1425_v43  ;;  %v1825_v58 = vadd.f32 %v1746_v10, %v3675_v34  ;;  %v4361_v16 = vld [vmem:[#allocation34_spill] sm:$0xff] }
 0x1f9   : > { %v1878_v33 = vpop.f32.mrf.mxu2  ;;  %v3973_v38 = vadd.f32 %v1681_v14, %v1559_v46  ;;  %v4362_v46 = vld [vmem:[#allocation14_spill] sm:$0xff] }
 0x1fa   : > { %v1958_v13 = vadd.f32 %v1878_v33, %v1824_v45 }
 0x1fb   : > { %2759 = vmatmul.msk.bf16.gmra.mxu3 %vm708_vm5, %v3288_v32 }
 0x1fd   : > { %v2174_v57 = vpop.f32.mrf.mxu0 }
 0x1fe   : > { %v2034_v1 = vpop.f32.mrf.mxu3  ;;  %v1749_v56 = vpop.f32.mrf.mxu1 }
 0x1ff   : > { %v2114_v50 = vadd.f32 %v2034_v1, %v1958_v13 }
 0x200   : > { %2777 = vmatmul.msk.bf16.gmra.mxu0 %vm708_vm5, %v3690_v48 }
 0x201   : > { %v2254_v47 = vadd.f32 %v2174_v57, %v2114_v50  ;;  %v1880_v8 = vpop.f32.mrf.mxu2  ;;  %2722 = vmatmul.msk.bf16.gmra.mxu1 %vm708_vm5, %v3690_v48  ;;  %v4359_v48 = vld [vmem:[#allocation33_spill] sm:$0xff] }
 0x202   : > { %v1959_v59 = vadd.f32 %v1880_v8, %v1825_v58  ;;  %v1826_v31 = vadd.f32 %v1749_v56, %v4359_v48 }
 0x203   : > { %v2289_v32 = vadd.f32 %v3980_v21, %v2254_v47  ;;  %v4363_v47 = vld [vmem:[#allocation35_spill] sm:$0xff] }
 0x205   : > { %v2321_v3 = vmax.f32 %v2289_v32, 0.0  ;;  %v2176_v0 = vpop.f32.mrf.mxu0 }
 0x206   : > { %v2036_v23 = vpop.f32.mrf.mxu3  ;;  %2743 = vmatmul.msk.bf16.gmra.mxu2 %vm708_vm5, %v3697_v55  ;;  %v1751_v35 = vpop.f32.mrf.mxu1 }
 0x207   : > { %v2353_v5 = vpack.c.bf16 %v2321_v3, %v2321_v3  ;;  %v2115_v29 = vadd.f32 %v2036_v23, %v1959_v59  ;;  %v1827_v45 = vadd.f32 %v1751_v35, %v4362_v46  ;;  %v4364_v3 = vld [vmem:[#allocation12_spill] sm:$0xff] }
 0x209   : > { %2386 = vst.msk [vmem:[%s3993_s9] sm:$0xf] %vm2385_vm9, %v2353_v5  ;;  %v2255_v34 = vadd.f32 %v2176_v0, %v2115_v29  ;;  %v1883_v28 = vpop.f32.mrf.mxu2  ;;  %v4365_v5 = vld [vmem:[#allocation6_spill] sm:$0xff] }
 0x20a   : > { %v1960_v26 = vadd.f32 %v1883_v28, %v1826_v31 }
 0x20b   : > { %v2290_v18 = vadd.f32 %v3980_v21, %v2255_v34  ;;  %2760 = vmatmul.msk.bf16.gmra.mxu3 %vm708_vm5, %v4360_v2 }
 0x20d   : > { %v2322_v55 = vmax.f32 %v2290_v18, 0.0  ;;  %v2179_v49 = vpop.f32.mrf.mxu0 }
 0x20e   : > { %v2039_v22 = vpop.f32.mrf.mxu3  ;;  %v1754_v7 = vpop.f32.mrf.mxu1 }
 0x20f   : > { %v2354_v43 = vpack.c.bf16 %v2322_v55, %v2322_v55  ;;  %v2116_v14 = vadd.f32 %v2039_v22, %v1960_v26  ;;  %v1828_v0 = vadd.f32 %v1754_v7, %v4364_v3  ;;  %v4366_v26 = vld [vmem:[#allocation38_spill] sm:$0xff] }
 0x210   : > { %2778 = vmatmul.msk.bf16.gmra.mxu0 %vm708_vm5, %v4361_v16 }
 0x211   : > { %2387 = vst.msk [vmem:[%s3993_s9 + $0x4] sm:$0xf] %vm2385_vm9, %v2354_v43  ;;  %v2256_v10 = vadd.f32 %v2179_v49, %v2116_v14  ;;  %v1885_v33 = vpop.f32.mrf.mxu2  ;;  %2723 = vmatmul.msk.bf16.gmra.mxu1 %vm708_vm5, %v4361_v16  ;;  %v4367_v49 = vld [vmem:[#allocation36_spill] sm:$0xff] }
 0x212   : > { %v1961_v57 = vadd.f32 %v1885_v33, %v1827_v45  ;;  %v4368_v45 = vld [vmem:[#allocation39_spill] sm:$0xff] }
 0x213   : > { %v2291_v13 = vadd.f32 %v3980_v21, %v2256_v10 }
 0x215   : > { %v2323_v1 = vmax.f32 %v2291_v13, 0.0  ;;  %v2181_v56 = vpop.f32.mrf.mxu0 }
 0x216   : > { %v2041_v50 = vpop.f32.mrf.mxu3  ;;  %2744 = vmatmul.msk.bf16.gmra.mxu2 %vm708_vm5, %v4363_v47  ;;  %v1756_v58 = vpop.f32.mrf.mxu1 }
 0x217   : > { %v2355_v8 = vpack.c.bf16 %v2323_v1, %v2323_v1  ;;  %v2117_v32 = vadd.f32 %v2041_v50, %v1961_v57  ;;  %v1829_v22 = vadd.f32 %v1756_v58, %v4367_v49 }
 0x219   : > { %2388 = vst.msk [vmem:[%s3993_s9 + $0x8] sm:$0xf] %vm2385_vm9, %v2355_v8  ;;  %v2257_v59 = vadd.f32 %v2181_v56, %v2117_v32  ;;  %v1888_v23 = vpop.f32.mrf.mxu2  ;;  %v4369_v56 = vld [vmem:[#allocation37_spill] sm:$0xff]  ;;  %v4370_v8 = vld [vmem:[#allocation7_spill] sm:$0xff] }
 0x21a   : > { %v1962_v29 = vadd.f32 %v1888_v23, %v1828_v0 }
 0x21b   : > { %v2292_v35 = vadd.f32 %v3980_v21, %v2257_v59  ;;  %2761 = vmatmul.msk.bf16.gmra.mxu3 %vm708_vm5, %v4365_v5 }
 0x21d   : > { %v2324_v34 = vmax.f32 %v2292_v35, 0.0  ;;  %v2184_v48 = vpop.f32.mrf.mxu0 }
 0x21e   : > { %v2044_v31 = vpop.f32.mrf.mxu3  ;;  %v1759_v28 = vpop.f32.mrf.mxu1 }
 0x21f   : > { %v2356_v18 = vpack.c.bf16 %v2324_v34, %v2324_v34  ;;  %v2118_v2 = vadd.f32 %v2044_v31, %v1962_v29  ;;  %v1830_v50 = vadd.f32 %v1759_v28, %v4369_v56  ;;  %v4371_v29 = vld [vmem:[#allocation42_spill] sm:$0xff] }
 0x220   : > { %2779 = vmatmul.msk.bf16.gmra.mxu0 %vm708_vm5, %v4366_v26 }
 0x221   : > { %2389 = vst.msk [vmem:[%s3993_s9 + $0xc] sm:$0xf] %vm2385_vm9, %v2356_v18  ;;  %v2258_v55 = vadd.f32 %v2184_v48, %v2118_v2  ;;  %v1890_v7 = vpop.f32.mrf.mxu2  ;;  %2724 = vmatmul.msk.bf16.gmra.mxu1 %vm708_vm5, %v4366_v26  ;;  %v4372_v48 = vld [vmem:[#allocation40_spill] sm:$0xff] }
 0x222   : > { %v1963_v14 = vadd.f32 %v1890_v7, %v1829_v22  ;;  %v4373_v22 = vld [vmem:[#allocation9_spill] sm:$0xff] }
 0x223   : > { %v2293_v43 = vadd.f32 %v3980_v21, %v2258_v55 }
 0x225   : > { %v2325_v16 = vmax.f32 %v2293_v43, 0.0  ;;  %v2186_v10 = vpop.f32.mrf.mxu0 }
 0x226   : > { %v2046_v46 = vpop.f32.mrf.mxu3  ;;  %2745 = vmatmul.msk.bf16.gmra.mxu2 %vm708_vm5, %v4368_v45  ;;  %v1761_v33 = vpop.f32.mrf.mxu1 }
 0x227   : > { %v2357_v13 = vpack.c.bf16 %v2325_v16, %v2325_v16  ;;  %v2119_v57 = vadd.f32 %v2046_v46, %v1963_v14  ;;  %v1831_v31 = vadd.f32 %v1761_v33, %v4372_v48 }
 0x229   : > { %2390 = vst.msk [vmem:[%s3993_s9 + $0x10] sm:$0xf] %vm2385_vm9, %v2357_v13  ;;  %v2259_v1 = vadd.f32 %v2186_v10, %v2119_v57  ;;  %v1893_v47 = vpop.f32.mrf.mxu2  ;;  %v4374_v10 = vld [vmem:[#allocation41_spill] sm:$0xff] }
 0x22a   : > { %v1964_v32 = vadd.f32 %v1893_v47, %v1830_v50  ;;  %v4375_v13 = vld [vmem:[#allocation13_spill] sm:$0xff] }
 0x22b   : > { %v2294_v58 = vadd.f32 %v3980_v21, %v2259_v1  ;;  %2762 = vmatmul.msk.bf16.gmra.mxu3 %vm708_vm5, %v4370_v8 }
 0x22d   : > { %v2326_v59 = vmax.f32 %v2294_v58, 0.0  ;;  %v2189_v3 = vpop.f32.mrf.mxu0 }
 0x22e   : > { %v2049_v0 = vpop.f32.mrf.mxu3  ;;  %v1764_v23 = vpop.f32.mrf.mxu1 }
 0x22f   : > { %v2358_v35 = vpack.c.bf16 %v2326_v59, %v2326_v59  ;;  %v2120_v5 = vadd.f32 %v2049_v0, %v1964_v32  ;;  %v1832_v46 = vadd.f32 %v1764_v23, %v4374_v10  ;;  %v4376_v32 = vld [vmem:[#allocation44_spill] sm:$0xff]  ;;  %v4067_v10 = vld [vmem:[%s3065_s19 + $0xcc] sm:$0xf] }
 0x230   : > { %2780 = vmatmul.msk.bf16.gmra.mxu0 %vm708_vm5, %v4371_v29 }
 0x231   : > { %2391 = vst.msk [vmem:[%s3993_s9 + $0x14] sm:$0xf] %vm2385_vm9, %v2358_v35  ;;  %v2260_v34 = vadd.f32 %v2189_v3, %v2120_v5  ;;  %v1895_v28 = vpop.f32.mrf.mxu2  ;;  %2725 = vmatmul.msk.bf16.gmra.mxu1 %vm708_vm5, %v4371_v29  ;;  %v4377_v3 = vld [vmem:[#allocation10_spill] sm:$0xff] }
 0x232   : > { %v1965_v2 = vadd.f32 %v1895_v28, %v1831_v31 }
 0x233   : > { %v2295_v18 = vadd.f32 %v3980_v21, %v2260_v34 }
 0x235   : > { %v2327_v26 = vmax.f32 %v2295_v18, 0.0  ;;  %v2191_v55 = vpop.f32.mrf.mxu0 }
 0x236   : > { %v2051_v49 = vpop.f32.mrf.mxu3  ;;  %2746 = vmatmul.msk.bf16.gmra.mxu2 %vm708_vm5, %v4373_v22  ;;  %v1766_v7 = vpop.f32.mrf.mxu1 }
 0x237   : > { %v2359_v43 = vpack.c.bf16 %v2327_v26, %v2327_v26  ;;  %v2121_v14 = vadd.f32 %v2051_v49, %v1965_v2  ;;  %v1833_v0 = vadd.f32 %v1766_v7, %v4377_v3  ;;  %v4378_v26 = vld [vmem:[#allocation43_spill] sm:$0xff] }
 0x239   : > { %2392 = vst.msk [vmem:[%s3993_s9 + $0x18] sm:$0xf] %vm2385_vm9, %v2359_v43  ;;  %v2261_v16 = vadd.f32 %v2191_v55, %v2121_v14  ;;  %v1898_v45 = vpop.f32.mrf.mxu2 }
 0x23a   : > { %v1966_v57 = vadd.f32 %v1898_v45, %v1832_v46  ;;  %v4070_v46 = vld [vmem:[%s3065_s19 + $0xd0] sm:$0xf] }
 0x23b   : > { %v2296_v33 = vadd.f32 %v3980_v21, %v2261_v16  ;;  %2763 = vmatmul.msk.bf16.gmra.mxu3 %vm708_vm5, %v4375_v13  ;;  %v4379_v16 = vld [vmem:[#allocation45_spill] sm:$0xff] }
 0x23d   : > { %v2328_v1 = vmax.f32 %v2296_v33, 0.0  ;;  %v2194_v56 = vpop.f32.mrf.mxu0 }
 0x23e   : > { %v2054_v50 = vpop.f32.mrf.mxu3  ;;  %v1769_v47 = vpop.f32.mrf.mxu1 }
 0x23f   : > { %v2360_v58 = vpack.c.bf16 %v2328_v1, %v2328_v1  ;;  %v2122_v8 = vadd.f32 %v2054_v50, %v1966_v57  ;;  %v1834_v55 = vadd.f32 %v1769_v47, %v4378_v26  ;;  %v4380_v1 = vld [vmem:[#allocation8_spill] sm:$0xff]  ;;  %v1994_v50 = vshll.u32 %v4067_v10, 16 }
 0x240   : > { %2781 = vmatmul.msk.bf16.gmra.mxu0 %vm708_vm5, %v4376_v32  ;;  %v2000_v47 = vshll.u32 %v4070_v46, 16 }
 0x241   : > { %2393 = vst.msk [vmem:[%s3993_s9 + $0x1c] sm:$0xf] %vm2385_vm9, %v2360_v58  ;;  %v2262_v59 = vadd.f32 %v2194_v56, %v2122_v8  ;;  %v1900_v23 = vpop.f32.mrf.mxu2  ;;  %2726 = vmatmul.msk.bf16.gmra.mxu1 %vm708_vm5, %v4376_v32  ;;  %v2711_v56 = vrot.slane %v4380_v1, 9  ;;  %v2004_v58 = vshrl.u32 %v4070_v46, 16 }
 0x242   : > { %v1967_v5 = vadd.f32 %v1900_v23, %v1833_v0  ;;  %v1722_v0 = vrot.slane %v3817_v61, 5 }
 0x243   : > { %v2297_v35 = vadd.f32 %v3980_v21, %v2262_v59 }
 0x245   : > { %v2329_v29 = vmax.f32 %v2297_v35, 0.0  ;;  %v2196_v34 = vpop.f32.mrf.mxu0 }
 0x246   : > { %v2056_v48 = vpop.f32.mrf.mxu3  ;;  %2747 = vmatmul.msk.bf16.gmra.mxu2 %vm708_vm5, %v3810_v40  ;;  %v1771_v31 = vpop.f32.mrf.mxu1  ;;  %v1719_v40 = vrot.slane %v4379_v16, 5 }
 0x247   : > { %v2361_v28 = vpack.c.bf16 %v2329_v29, %v2329_v29  ;;  %v2123_v18 = vadd.f32 %v2056_v48, %v1967_v5  ;;  %v1835_v32 = vadd.f32 %v1771_v31, %v3814_v42  ;;  %v2002_v48 = vrot.slane %v2000_v47, 5 }
 0x248   : > { %v1721_v3 = vrot.slane %v1719_v40, 4  ;;  %v1720_v5 = vsel %vm3395_vm8, %v2711_v56, %v1719_v40 }
 0x249   : > { %2394 = vst.msk [vmem:[%s3993_s9 + $0x20] sm:$0xf] %vm2385_vm9, %v2361_v28  ;;  %v2263_v2 = vadd.f32 %v2196_v34, %v2123_v18  ;;  %v1903_v49 = vpop.f32.mrf.mxu2  ;;  %v1996_v34 = vrot.slane %v1994_v50, 5  ;;  %v2006_v28 = vrot.slane %v2004_v58, 4  ;;  %v2149_v58 = vrot.slane %v4070_v46, 5 }
 0x24a   : > { %v1968_v7 = vadd.f32 %v1903_v49, %v1834_v55  ;;  %v1723_v31 = vsel %vm3395_vm8, %v1721_v3, %v1722_v0  ;;  %v1726_v49 = vunpack.c.l.b16 %v1720_v5  ;;  %v2767_v3 = vrot.slane %v4067_v10, 9 }
 0x24b   : > { %v2298_v22 = vadd.f32 %v3980_v21, %v2263_v2  ;;  %2764 = vmatmul.msk.bf16.gmra.mxu3 %vm708_vm5, %v3404_v62  ;;  %v1991_v62 = vshrl.u32 %v4067_v10, 16 }
 0x24c   : > { %v2150_v10 = vsel %vm3395_vm8, %v2767_v3, %v2149_v58 }
 0x24d   : > { %v2330_v43 = vmax.f32 %v2298_v22, 0.0  ;;  %v2199_v14 = vpop.f32.mrf.mxu0  ;;  %v1993_v29 = vrot.slane %v1991_v62, 4  ;;  %v1727_v22 = vunpack.c.l.b16 %v1723_v31 }
 0x24e   : > { %v2059_v45 = vpop.f32.mrf.mxu3  ;;  %v1774_v33 = vpop.f32.mrf.mxu1 }
 0x24f   : > { %v2362_v13 = vpack.c.bf16 %v2330_v43, %v2330_v43  ;;  %v2124_v57 = vadd.f32 %v2059_v45, %v1968_v7  ;;  %v1997_v7 = vor.u32 %v1996_v34, %v1993_v29  ;;  %v2007_v43 = vor.u32 %v2006_v28, %v2002_v48  ;;  %v2807_v29 = vld [vmem:[%s3065_s19 + $0xcc] sm:$0xff] }
 0x250   : > { %2782 = vmatmul.msk.bf16.gmra.mxu0 %vm708_vm5, %v3833_v52  ;;  %v1836_v40 = vadd.f32 %v1774_v33, %v3831_v17 }
 0x251   : > { %2395 = vst.msk [vmem:[%s3993_s9 + $0x24] sm:$0xf] %vm2385_vm9, %v2362_v13  ;;  %v2264_v8 = vadd.f32 %v2199_v14, %v2124_v57  ;;  %v1905_v59 = vpop.f32.mrf.mxu2  ;;  %2727 = vmatmul.msk.bf16.gmra.mxu1 %vm708_vm5, %v3833_v52  ;;  %v268_v52 = vld [vmem:[%s3065_s19 + $0xd4] sm:$0x1]  ;;  %v1728_v57 = vpack.c.b16 %v1727_v22, %v1726_v49  ;;  %v1998_v1 = vrot.slane %v1997_v7, 4  ;;  %v2008_v56 = vrot.slane %v2007_v43, 4  ;;  %s2431_s19 = scalar_lea.hbm %s4238_s3, %s2808_s10 }
 0x252   : > { %v1969_v35 = vadd.f32 %v1905_v59, %v1835_v32  ;;  %v2010_v14 = vshll.u32 %v268_v52, 16  ;;  %v2152_v5 = vrot.slane %v268_v52, 5  ;;  %s2434_s23 = sshll.u32 %s2431_s19, 4  ;;  %s2435_s23 = int_to_ptr.hbm [resolvable:$true] %s2434_s23 }
 0x253   : > { %v2299_v23 = vadd.f32 %v3980_v21, %v2264_v8  ;;  %s2894_s26 = sshra.s32 %s2435_s23, 4  ;;  %s2895_s26 = int_to_ptr.hbm [resolvable:$true] %s2894_s26 }
 0x254   : > { %v2012_v62 = vrot.slane %v2010_v14, 5  ;;  %s2896_s27 = scalar_lea.hbm %s2895_s26, 128  ;;  %p2901_p1 = scmp.lt.s32.totalorder %s2895_s26, %s4238_s3 }
 0x255   : > { %v2331_v18 = vmax.f32 %v2299_v23, 0.0  ;;  %v2201_v42 = vpop.f32.mrf.mxu0  ;;  %p2897_p12 = scmp.ne.s32.totalorder %s2895_s26, %s2896_s27  ;;  %p2902_p2 = scmp.lt.s32.totalorder %s2900_s30, %s2896_s27 }
 0x256   : > { %v2061_v2 = vpop.f32.mrf.mxu3  ;;  %2748 = vmatmul.msk.bf16.gmra.mxu2 %vm708_vm5, %v3842_v51  ;;  %v1776_v61 = vpop.f32.mrf.mxu1  ;;  %v2013_v59 = vsel %vm3092_vm4, %v2008_v56, %v2012_v62 }
 0x257   : > { %v2363_v26 = vpack.c.bf16 %v2331_v18, %v2331_v18  ;;  %v2125_v55 = vadd.f32 %v2061_v2, %v1969_v35  ;;  %v1837_v46 = vadd.f32 %v1776_v61, %v3845_v25  ;;  %v2151_v35 = vrot.slane %v2149_v58, 4  ;;  %p2898_p13 = pnand %p2897_p12, %p3023_p4  ;;  %p2903_p3 = por %p2902_p2, %p2901_p1 }
 0x258   : > { %v2017_v39 = vunpack.c.l.b16 %v2013_v59 }
 0x259   : > { %2396 = vst.msk [vmem:[%s3993_s9 + $0x28] sm:$0xf] %vm2385_vm9, %v2363_v26  ;;  %v2265_v16 = vadd.f32 %v2201_v42, %v2125_v55  ;;  %v1908_v45 = vpop.f32.mrf.mxu2  ;;  %v2153_v25 = vsel %vm3395_vm8, %v2151_v35, %v2152_v5  ;;  %v2156_v55 = vunpack.c.l.b16 %v2150_v10  ;;  %p2899_p0 = pneg %p2898_p13 }
 0x25a   : > { %v1970_v51 = vadd.f32 %v1908_v45, %v1836_v40  ;;  %v2157_v49 = vunpack.c.l.b16 %v2153_v25 }
 0x25b   : > { %v2300_v13 = vadd.f32 %v3980_v21, %v2265_v16  ;;  %2765 = vmatmul.msk.bf16.gmra.mxu3 %vm708_vm5, %v3849_v11  ;;  %v2003_v11 = vsel %vm3092_vm4, %v1998_v1, %v2002_v48  ;;  %p2904_p5 = pnand %p2903_p3, %p2899_p0 }
 0x25c   : > { %v2016_v28 = vunpack.c.l.b16 %v2003_v11  ;;  %v2158_v16 = vpack.c.b16 %v2157_v49, %v2156_v55 }
 0x25d   : > { %v2332_v50 = vmax.f32 %v2300_v13, 0.0  ;;  %v2204_v47 = vpop.f32.mrf.mxu0 }
 0x25e   : > { %v2064_v8 = vpop.f32.mrf.mxu3  ;;  %v1779_v32 = vpop.f32.mrf.mxu1  ;;  %v2018_v26 = vpack.c.b16 %v2017_v39, %v2016_v28 }
 0x25f   : > { %v2364_v17 = vpack.c.bf16 %v2332_v50, %v2332_v50  ;;  %v2126_v33 = vadd.f32 %v2064_v8, %v1970_v51  ;;  %v1838_v7 = vadd.f32 %v1779_v32, %v3856_v27 }
 0x260   : > { %2783 = vmatmul.msk.bf16.gmra.mxu0 %vm708_vm5, %v1728_v57 }
 0x261   : > { %2397 = vst.msk [vmem:[%s3993_s9 + $0x2c] sm:$0xf] %vm2385_vm9, %v2364_v17  ;;  %v2266_v0 = vadd.f32 %v2204_v47, %v2126_v33  ;;  %v1910_v23 = vpop.f32.mrf.mxu2  ;;  %2728 = vmatmul.msk.bf16.gmra.mxu1 %vm708_vm5, %v1728_v57 }
 0x262   : > { %v1971_v48 = vadd.f32 %v1910_v23, %v1837_v46 }
 0x263   : > { %v2301_v34 = vadd.f32 %v3980_v21, %v2266_v0 }
 0x265   : > { %v2333_v18 = vmax.f32 %v2301_v34, 0.0  ;;  %v2206_v42 = vpop.f32.mrf.mxu0 }
 0x266   : > { %v2066_v31 = vpop.f32.mrf.mxu3  ;;  %2749 = vmatmul.msk.bf16.gmra.mxu2 %vm708_vm5, %v2807_v29  ;;  %v1781_v2 = vpop.f32.mrf.mxu1 }
 0x267   : > { %v2365_v52 = vpack.c.bf16 %v2333_v18, %v2333_v18  ;;  %v2127_v61 = vadd.f32 %v2066_v31, %v1971_v48  ;;  %v1839_v27 = vadd.f32 %v1781_v2, %v3861_v41 }
 0x269   : > { %2398 = vst.msk [vmem:[%s3993_s9 + $0x30] sm:$0xf] %vm2385_vm9, %v2365_v52  ;;  %v2267_v22 = vadd.f32 %v2206_v42, %v2127_v61  ;;  %v1913_v43 = vpop.f32.mrf.mxu2 }
 0x26a   : > { %v1972_v30 = vadd.f32 %v1913_v43, %v1838_v7 }
 0x26b   : > { %v2302_v14 = vadd.f32 %v3980_v21, %v2267_v22  ;;  %2766 = vmatmul.msk.bf16.gmra.mxu3 %vm708_vm5, %v2018_v26 }
 0x26d   : > { %v2334_v40 = vmax.f32 %v2302_v14, 0.0  ;;  %v2209_v45 = vpop.f32.mrf.mxu0 }
 0x26e   : > { %v2069_v13 = vpop.f32.mrf.mxu3  ;;  %v1784_v51 = vpop.f32.mrf.mxu1 }
 0x26f   : > { %v2366_v57 = vpack.c.bf16 %v2334_v40, %v2334_v40  ;;  %v2128_v1 = vadd.f32 %v2069_v13, %v1972_v30  ;;  %v1840_v3 = vadd.f32 %v1784_v51, %v3870_v12 }
 0x270   : > { %2784 = vmatmul.msk.bf16.gmra.mxu0 %vm708_vm5, %v2158_v16 }
 0x271   : > { %2399 = vst.msk [vmem:[%s3993_s9 + $0x34] sm:$0xf] %vm2385_vm9, %v2366_v57  ;;  %v2268_v56 = vadd.f32 %v2209_v45, %v2128_v1  ;;  %v1915_v62 = vpop.f32.mrf.mxu2 }
 0x272   : > { %v1973_v47 = vadd.f32 %v1915_v62, %v1839_v27 }
 0x273   : > { %v2303_v50 = vadd.f32 %v3980_v21, %v2268_v56 }
 0x275   : > { %v2335_v58 = vmax.f32 %v2303_v50, 0.0  ;;  %v2211_v8 = vpop.f32.mrf.mxu0 }
 0x276   : > { %v2071_v32 = vpop.f32.mrf.mxu3  ;;  %v1786_v17 = vpop.f32.mrf.mxu1 }
 0x277   : > { %v2367_v33 = vpack.c.bf16 %v2335_v58, %v2335_v58  ;;  %v2129_v11 = vadd.f32 %v2071_v32, %v1973_v47  ;;  %v1841_v39 = vadd.f32 %v1786_v17, %v3875_v36 }
 0x279   : > { %2400 = vst.msk [vmem:[%s3993_s9 + $0x38] sm:$0xf] %vm2385_vm9, %v2367_v33  ;;  %v2269_v59 = vadd.f32 %v2211_v8, %v2129_v11  ;;  %v1918_v0 = vpop.f32.mrf.mxu2 }
 0x27a   : > { %v1974_v41 = vadd.f32 %v1918_v0, %v1840_v3 }
 0x27b   : > { %v2304_v46 = vadd.f32 %v3980_v21, %v2269_v59 }
 0x27d   : > { %v2336_v23 = vmax.f32 %v2304_v46, 0.0  ;;  %v2214_v35 = vpop.f32.mrf.mxu0 }
 0x27e   : > { %v2074_v5 = vpop.f32.mrf.mxu3  ;;  %v1789_v29 = vpop.f32.mrf.mxu1 }
 0x27f   : > { %v2368_v34 = vpack.c.bf16 %v2336_v23, %v2336_v23  ;;  %v2130_v48 = vadd.f32 %v2074_v5, %v1974_v41  ;;  %v1842_v55 = vadd.f32 %v1789_v29, %v3884_v54 }
 0x281   : > { %2401 = vst.msk [vmem:[%s3993_s9 + $0x3c] sm:$0xf] %vm2385_vm9, %v2368_v34  ;;  %v2270_v28 = vadd.f32 %v2214_v35, %v2130_v48  ;;  %v1920_v18 = vpop.f32.mrf.mxu2 }
 0x282   : > { %v1975_v12 = vadd.f32 %v1920_v18, %v1841_v39 }
 0x283   : > { %v2305_v42 = vadd.f32 %v3980_v21, %v2270_v28 }
 0x285   : > { %v2337_v10 = vmax.f32 %v2305_v42, 0.0  ;;  %v2216_v25 = vpop.f32.mrf.mxu0 }
 0x286   : > { %v2076_v31 = vpop.f32.mrf.mxu3  ;;  %v1791_v2 = vpop.f32.mrf.mxu1 }
 0x287   : > { %v2369_v52 = vpack.c.bf16 %v2337_v10, %v2337_v10  ;;  %v2131_v61 = vadd.f32 %v2076_v31, %v1975_v12  ;;  %v1843_v13 = vadd.f32 %v1791_v2, %v3889_v63 }
 0x289   : > { %2402 = vst.msk [vmem:[%s3993_s9 + $0x40] sm:$0xf] %vm2385_vm9, %v2369_v52  ;;  %v2271_v26 = vadd.f32 %v2216_v25, %v2131_v61  ;;  %v1923_v49 = vpop.f32.mrf.mxu2 }
 0x28a   : > { %v1976_v36 = vadd.f32 %v1923_v49, %v1842_v55 }
 0x28b   : > { %v2306_v22 = vadd.f32 %v3980_v21, %v2271_v26 }
 0x28d   : > { %v2338_v7 = vmax.f32 %v2306_v22, 0.0  ;;  %v2219_v43 = vpop.f32.mrf.mxu0 }
 0x28e   : > { %v2079_v14 = vpop.f32.mrf.mxu3  ;;  %v1794_v30 = vpop.f32.mrf.mxu1 }
 0x28f   : > { %v2370_v16 = vpack.c.bf16 %v2338_v7, %v2338_v7  ;;  %v2132_v40 = vadd.f32 %v2079_v14, %v1976_v36  ;;  %v1844_v8 = vadd.f32 %v1794_v30, %v3898_v4 }
 0x291   : > { %2403 = vst.msk [vmem:[%s3993_s9 + $0x44] sm:$0xf] %vm2385_vm9, %v2370_v16  ;;  %v2272_v45 = vadd.f32 %v2219_v43, %v2132_v40  ;;  %v1925_v51 = vpop.f32.mrf.mxu2 }
 0x292   : > { %v1977_v54 = vadd.f32 %v1925_v51, %v1843_v13 }
 0x293   : > { %v2307_v57 = vadd.f32 %v3980_v21, %v2272_v45 }
 0x295   : > { %v2339_v1 = vmax.f32 %v2307_v57, 0.0  ;;  %v2221_v56 = vpop.f32.mrf.mxu0 }
 0x296   : > { %v2081_v27 = vpop.f32.mrf.mxu3  ;;  %v1796_v62 = vpop.f32.mrf.mxu1 }
 0x297   : > { %v2371_v50 = vpack.c.bf16 %v2339_v1, %v2339_v1  ;;  %v2133_v47 = vadd.f32 %v2081_v27, %v1977_v54  ;;  %v1845_v23 = vadd.f32 %v1796_v62, %v3903_v6 }
 0x299   : > { %2404 = vst.msk [vmem:[%s3993_s9 + $0x48] sm:$0xf] %vm2385_vm9, %v2371_v50  ;;  %v2273_v58 = vadd.f32 %v2221_v56, %v2133_v47  ;;  %v1928_v32 = vpop.f32.mrf.mxu2 }
 0x29a   : > { %v1978_v63 = vadd.f32 %v1928_v32, %v1844_v8 }
 0x29b   : > { %v2308_v17 = vadd.f32 %v3980_v21, %v2273_v58 }
 0x29d   : > { %v2340_v33 = vmax.f32 %v2308_v17, 0.0  ;;  %v2224_v11 = vpop.f32.mrf.mxu0 }
 0x29e   : > { %v2084_v59 = vpop.f32.mrf.mxu3  ;;  %v1799_v3 = vpop.f32.mrf.mxu1 }
 0x29f   : > { %v2372_v0 = vpack.c.bf16 %v2340_v33, %v2340_v33  ;;  %v2134_v46 = vadd.f32 %v2084_v59, %v1978_v63  ;;  %v1846_v12 = vadd.f32 %v1799_v3, %v3912_v53 }
 0x2a1   : > { %2405 = vst.msk [vmem:[%s3993_s9 + $0x4c] sm:$0xf] %vm2385_vm9, %v2372_v0  ;;  %v2274_v41 = vadd.f32 %v2224_v11, %v2134_v46  ;;  %v1930_v35 = vpop.f32.mrf.mxu2 }
 0x2a2   : > { %v1979_v4 = vadd.f32 %v1930_v35, %v1845_v23 }
 0x2a3   : > { %v2309_v5 = vadd.f32 %v3980_v21, %v2274_v41 }
 0x2a5   : > { %v2341_v29 = vmax.f32 %v2309_v5, 0.0  ;;  %v2226_v34 = vpop.f32.mrf.mxu0 }
 0x2a6   : > { %v2086_v48 = vpop.f32.mrf.mxu3  ;;  %v1801_v28 = vpop.f32.mrf.mxu1 }
 0x2a7   : > { %v2373_v39 = vpack.c.bf16 %v2341_v29, %v2341_v29  ;;  %v2135_v18 = vadd.f32 %v2086_v48, %v1979_v4  ;;  %v1847_v22 = vadd.f32 %v1801_v28, %v3917_v37 }
 0x2a9   : > { %2406 = vst.msk [vmem:[%s3993_s9 + $0x50] sm:$0xf] %vm2385_vm9, %v2373_v39  ;;  %v2275_v42 = vadd.f32 %v2226_v34, %v2135_v18  ;;  %v1933_v10 = vpop.f32.mrf.mxu2 }
 0x2aa   : > { %v1980_v6 = vadd.f32 %v1933_v10, %v1846_v12 }
 0x2ab   : > { %v2310_v25 = vadd.f32 %v3980_v21, %v2275_v42 }
 0x2ad   : > { %v2342_v31 = vmax.f32 %v2310_v25, 0.0  ;;  %v2229_v2 = vpop.f32.mrf.mxu0 }
 0x2ae   : > { %v2089_v52 = vpop.f32.mrf.mxu3  ;;  %v1804_v61 = vpop.f32.mrf.mxu1 }
 0x2af   : > { %v2374_v26 = vpack.c.bf16 %v2342_v31, %v2342_v31  ;;  %v2136_v55 = vadd.f32 %v2089_v52, %v1980_v6  ;;  %v1848_v51 = vadd.f32 %v1804_v61, %v3926_v20 }
 0x2b1   : > { %2407 = vst.msk [vmem:[%s3993_s9 + $0x54] sm:$0xf] %vm2385_vm9, %v2374_v26  ;;  %v2276_v49 = vadd.f32 %v2229_v2, %v2136_v55  ;;  %v1935_v36 = vpop.f32.mrf.mxu2 }
 0x2b2   : > { %v1981_v53 = vadd.f32 %v1935_v36, %v1847_v22 }
 0x2b3   : > { %v2311_v7 = vadd.f32 %v3980_v21, %v2276_v49 }
 0x2b5   : > { %v2343_v43 = vmax.f32 %v2311_v7, 0.0  ;;  %v2231_v14 = vpop.f32.mrf.mxu0 }
 0x2b6   : > { %v2091_v30 = vpop.f32.mrf.mxu3  ;;  %v1806_v16 = vpop.f32.mrf.mxu1 }
 0x2b7   : > { %v2375_v40 = vpack.c.bf16 %v2343_v43, %v2343_v43  ;;  %v2137_v45 = vadd.f32 %v2091_v30, %v1981_v53  ;;  %v1849_v8 = vadd.f32 %v1806_v16, %v3931_v15 }
 0x2b9   : > { %2408 = vst.msk [vmem:[%s3993_s9 + $0x58] sm:$0xf] %vm2385_vm9, %v2375_v40  ;;  %v2277_v13 = vadd.f32 %v2231_v14, %v2137_v45  ;;  %v1938_v57 = vpop.f32.mrf.mxu2 }
 0x2ba   : > { %v1982_v37 = vadd.f32 %v1938_v57, %v1848_v51 }
 0x2bb   : > { %v2312_v54 = vadd.f32 %v3980_v21, %v2277_v13 }
 0x2bd   : > { %v2344_v1 = vmax.f32 %v2312_v54, 0.0  ;;  %v2234_v56 = vpop.f32.mrf.mxu0 }
 0x2be   : > { %v2094_v27 = vpop.f32.mrf.mxu3  ;;  %v1809_v62 = vpop.f32.mrf.mxu1 }
 0x2bf   : > { %v2376_v50 = vpack.c.bf16 %v2344_v1, %v2344_v1  ;;  %v2138_v47 = vadd.f32 %v2094_v27, %v1982_v37  ;;  %v1850_v41 = vadd.f32 %v1809_v62, %v3940_v19 }
 0x2c1   : > { %2409 = vst.msk [vmem:[%s3993_s9 + $0x5c] sm:$0xf] %vm2385_vm9, %v2376_v50  ;;  %v2278_v58 = vadd.f32 %v2234_v56, %v2138_v47  ;;  %v1940_v32 = vpop.f32.mrf.mxu2 }
 0x2c2   : > { %v1983_v20 = vadd.f32 %v1940_v32, %v1849_v8 }
 0x2c3   : > { %v2313_v17 = vadd.f32 %v3980_v21, %v2278_v58 }
 0x2c5   : > { %v2345_v63 = vmax.f32 %v2313_v17, 0.0  ;;  %v2236_v33 = vpop.f32.mrf.mxu0 }
 0x2c6   : > { %v2096_v11 = vpop.f32.mrf.mxu3  ;;  %v1811_v59 = vpop.f32.mrf.mxu1 }
 0x2c7   : > { %v2377_v3 = vpack.c.bf16 %v2345_v63, %v2345_v63  ;;  %v2139_v0 = vadd.f32 %v2096_v11, %v1983_v20  ;;  %v1851_v18 = vadd.f32 %v1811_v59, %v3945_v60 }
 0x2c9   : > { %2410 = vst.msk [vmem:[%s3993_s9 + $0x60] sm:$0xf] %vm2385_vm9, %v2377_v3  ;;  %v2279_v46 = vadd.f32 %v2236_v33, %v2139_v0  ;;  %v1943_v23 = vpop.f32.mrf.mxu2 }
 0x2ca   : > { %v1984_v15 = vadd.f32 %v1943_v23, %v1850_v41 }
 0x2cb   : > { %v2314_v35 = vadd.f32 %v3980_v21, %v2279_v46 }
 0x2cd   : > { %v2346_v5 = vmax.f32 %v2314_v35, 0.0  ;;  %v2239_v4 = vpop.f32.mrf.mxu0 }
 0x2ce   : > { %v2099_v29 = vpop.f32.mrf.mxu3  ;;  %v1814_v28 = vpop.f32.mrf.mxu1 }
 0x2cf   : > { %v2378_v34 = vpack.c.bf16 %v2346_v5, %v2346_v5  ;;  %v2140_v48 = vadd.f32 %v2099_v29, %v1984_v15  ;;  %v1852_v61 = vadd.f32 %v1814_v28, %v3954_v24 }
 0x2d1   : > { %2411 = vst.msk [vmem:[%s3993_s9 + $0x64] sm:$0xf] %vm2385_vm9, %v2378_v34  ;;  %v2280_v39 = vadd.f32 %v2239_v4, %v2140_v48  ;;  %v1945_v42 = vpop.f32.mrf.mxu2 }
 0x2d2   : > { %v1985_v19 = vadd.f32 %v1945_v42, %v1851_v18 }
 0x2d3   : > { %v2315_v12 = vadd.f32 %v3980_v21, %v2280_v39 }
 0x2d5   : > { %v2347_v10 = vmax.f32 %v2315_v12, 0.0  ;;  %v2241_v25 = vpop.f32.mrf.mxu0 }
 0x2d6   : > { %v2101_v6 = vpop.f32.mrf.mxu3  ;;  %v1816_v55 = vpop.f32.mrf.mxu1 }
 0x2d7   : > { %v2379_v31 = vpack.c.bf16 %v2347_v10, %v2347_v10  ;;  %v2141_v2 = vadd.f32 %v2101_v6, %v1985_v19  ;;  %v1853_v30 = vadd.f32 %v1816_v55, %v3959_v44 }
 0x2d9   : > { %2412 = vst.msk [vmem:[%s3993_s9 + $0x68] sm:$0xf] %vm2385_vm9, %v2379_v31  ;;  %v2281_v52 = vadd.f32 %v2241_v25, %v2141_v2  ;;  %v1948_v26 = vpop.f32.mrf.mxu2 }
 0x2da   : > { %v1986_v60 = vadd.f32 %v1948_v26, %v1852_v61 }
 0x2db   : > { %v2316_v49 = vadd.f32 %v3980_v21, %v2281_v52 }
 0x2dd   : > { %v2348_v22 = vmax.f32 %v2316_v49, 0.0  ;;  %v2244_v36 = vpop.f32.mrf.mxu0 }
 0x2de   : > { %v2104_v7 = vpop.f32.mrf.mxu3  ;;  %v1819_v45 = vpop.f32.mrf.mxu1 }
 0x2df   : > { %v2380_v53 = vpack.c.bf16 %v2348_v22, %v2348_v22  ;;  %v2142_v43 = vadd.f32 %v2104_v7, %v1986_v60  ;;  %v1854_v56 = vadd.f32 %v1819_v45, %v3968_v9 }
 0x2e1   : > { %2413 = vst.msk [vmem:[%s3993_s9 + $0x6c] sm:$0xf] %vm2385_vm9, %v2380_v53  ;;  %v2282_v14 = vadd.f32 %v2244_v36, %v2142_v43  ;;  %v1950_v16 = vpop.f32.mrf.mxu2 }
 0x2e2   : > { %v1987_v24 = vadd.f32 %v1950_v16, %v1853_v30 }
 0x2e3   : > { %v2317_v40 = vadd.f32 %v3980_v21, %v2282_v14 }
 0x2e5   : > { %v2349_v13 = vmax.f32 %v2317_v40, 0.0  ;;  %v2246_v51 = vpop.f32.mrf.mxu0 }
 0x2e6   : > { %v2106_v57 = vpop.f32.mrf.mxu3  ;;  %v1821_v47 = vpop.f32.mrf.mxu1 }
 0x2e7   : > { %v2381_v54 = vpack.c.bf16 %v2349_v13, %v2349_v13  ;;  %v2143_v37 = vadd.f32 %v2106_v57, %v1987_v24  ;;  %v1855_v63 = vadd.f32 %v1821_v47, %v3973_v38 }
 0x2e9   : > { %2414 = vst.msk [vmem:[%s3993_s9 + $0x70] sm:$0xf] %vm2385_vm9, %v2381_v54  ;;  %v2283_v1 = vadd.f32 %v2246_v51, %v2143_v37  ;;  %v1953_v27 = vpop.f32.mrf.mxu2 }
 0x2ea   : > { %v1988_v62 = vadd.f32 %v1953_v27, %v1854_v56 }
 0x2eb   : > { %v2318_v44 = vadd.f32 %v3980_v21, %v2283_v1 }
 0x2ed   : > { %v2350_v50 = vmax.f32 %v2318_v44, 0.0  ;;  %v2249_v58 = vpop.f32.mrf.mxu0 }
 0x2ee   : > { %v2109_v8 = vpop.f32.mrf.mxu3 }
 0x2ef   : > { %v2382_v32 = vpack.c.bf16 %v2350_v50, %v2350_v50  ;;  %v2144_v17 = vadd.f32 %v2109_v8, %v1988_v62 }
 0x2f1   : > { %2415 = vst.msk [vmem:[%s3993_s9 + $0x74] sm:$0xf] %vm2385_vm9, %v2382_v32  ;;  %v2284_v20 = vadd.f32 %v2249_v58, %v2144_v17  ;;  %v1955_v33 = vpop.f32.mrf.mxu2 }
 0x2f2   : > { %v1989_v11 = vadd.f32 %v1955_v33, %v1855_v63 }
 0x2f3   : > { %v2319_v9 = vadd.f32 %v3980_v21, %v2284_v20 }
 0x2f5   : > { %v2351_v59 = vmax.f32 %v2319_v9, 0.0  ;;  %v2251_v41 = vpop.f32.mrf.mxu0 }
 0x2f6   : > { %v2111_v3 = vpop.f32.mrf.mxu3 }
 0x2f7   : > { %v2383_v0 = vpack.c.bf16 %v2351_v59, %v2351_v59  ;;  %v2145_v46 = vadd.f32 %v2111_v3, %v1989_v11 }
 0x2f9   : > { %2416 = vst.msk [vmem:[%s3993_s9 + $0x78] sm:$0xf] %vm2385_vm9, %v2383_v0  ;;  %v2285_v38 = vadd.f32 %v2251_v41, %v2145_v46 }
 0x2fb   : > { %v2320_v23 = vadd.f32 %v3980_v21, %v2285_v38 }
 0x2fd   : > { %v2352_v35 = vmax.f32 %v2320_v23, 0.0 }
 0x2ff   : > { %v2384_v15 = vpack.c.bf16 %v2352_v35, %v2352_v35 }
 0x301   : > { %2417 = vst.msk [vmem:[%s3993_s9 + $0x7c] sm:$0xf] %vm2385_vm9, %v2384_v15 }
 0x302   : > { %2907 = shalt.err (!%p2904_p5)
}
 0x303   : > { %s2961_s6 = smov 64   ;;  %s2962_s7 = smov 4  }
 0x304   : > { %2813 = dma.vmem_to_hbm [thread:$0]  (%p3023_p4), %s2433_s21, 2048, %s2435_s23, %s2419_s15, %s2961_s6, %s2961_s6, %s2962_s7  }
 0x305 PF: > { %p2819_p6 = scmp.ge.s32.totalorder %s2958_s17, 2  ;;  %s2449_s8 = sand.u32 1, %s2938_s12  }
 0x306   : > { %s2450_s9 = scalar_lea.sflag [#allocation3], %s2449_s8 }
 0x307   : > { %p2816_p7 = pnand %p2819_p6, %p3030_p8 }
 0x309   : > { %p2817_p9 = pneg %p2816_p7 }
 0x30b   : > { %2933 = dma.done.wait (%p2817_p9), %s2450_s9, 2048  }
 0x30c   : > { %2935 = vsyncadd (%p2817_p9), %s2450_s9, 4294965248  ;;  %s16_s17 = sadd.s32 1, %s2958_s17   ;;  %s4381_s12 = smov %s2942_s13 }
 0x30d   : > { %p13_p10 = scmp.ge.s32.totalorder %s16_s17, 6   ;;  %s4382_s13 = smov %s2946_s14 }
 0x30e   : > { %s4383_s14 = smov %s3036_s25  ;;  %s4384_s15 = smov %s2954_s16 }
 0x30f   : > { %s4385_s16 = smov %s4387_s20  ;;  %15 = sbr.rel (!%p13_p10) target bundleno = 4 (0x4), region = 81 }
 0x314   :  { %2456 = vsyncpa [#allocation3], 1 }
 0x315   :  { %2458 = vsyncpa [#allocation3 + $0x1], 1 }

</bundles_post_ra>
